<compile_context>
chip_gen: v5e
topology: v5e:2x2
jax: 0.10.0
libtpu: 0.0.40
codegen_flags: <defaults>
</compile_context>

<pallas_src>
import jax
import jax.numpy as jnp
from jax.experimental import pallas as pl
from jax.experimental.pallas import tpu as pltpu


_BN_EPS = 1e-5
_HEAD_PAD = 128      # lane-dense padded width for the 10-way head
_IN_PAD = 896        # 7 * 128, lane-aligned padded input width (784 -> 896)
_SUBLANE_PACK = 16   # bf16 packs [16, 128] elements per vreg
_N_HIDDEN = 4


def _vmem_spec():
    return pl.BlockSpec(memory_space=pltpu.MemorySpace.VMEM)


def fused_mlp_kernel(x_ref,
                     w1_ref, w2_ref, w3_ref, w4_ref, wf_ref,
                     bn_ref,
                     o_ref):
    """Whole MLP forward on full (B_pad, *) tiles resident in VMEM.

    bn_ref layout (f32, shape (2*L+1, n_units)):
      row 2*i   : gamma of hidden layer i
      row 2*i+1 : beta  of hidden layer i
      row 2*L   : final-head bias, zero-padded, first _HEAD_PAD lanes used
    """
    bn = bn_ref[...]  # single small load, sliced statically below

    def hidden(h, w_ref, layer):
        # Linear (no bias: cancelled exactly by the BN mean subtraction).
        z = jnp.dot(h, w_ref[...], preferred_element_type=jnp.float32)
        # BatchNorm1d, training-mode: per-feature batch mean, biased variance.
        mean = jnp.mean(z, axis=0, keepdims=True)
        centered = z - mean
        var = jnp.mean(centered * centered, axis=0, keepdims=True)
        gamma = bn[2 * layer: 2 * layer + 1, :]
        beta = bn[2 * layer + 1: 2 * layer + 2, :]
        # Fold BN into one scale/shift (2 VALU ops/elem in the apply path).
        s = gamma * jax.lax.rsqrt(var + _BN_EPS)       # (1, N)
        b = beta - mean * s                            # (1, N)
        # Tanh on the EUP; keep activation bf16 for the next MXU matmul.
        return jnp.tanh(z * s + b).astype(jnp.bfloat16)

    h = x_ref[...]                       # (B_pad, 896) bf16
    h = hidden(h, w1_ref, 0)
    h = hidden(h, w2_ref, 1)
    h = hidden(h, w3_ref, 2)
    h = hidden(h, w4_ref, 3)

    # Final classifier: lane-dense (B_pad, 128) output, f32 bias.
    b_f = bn[2 * _N_HIDDEN: 2 * _N_HIDDEN + 1, :_HEAD_PAD]
    out = jnp.dot(h, wf_ref[...], preferred_element_type=jnp.float32) + b_f
    o_ref[...] = out.astype(o_ref.dtype)


def fused_forward_call(x2d_bf16, params):
    """Single fused pallas_call over the whole network."""
    batch_pad = x2d_bf16.shape[0]
    w1, w2, w3, w4, wf = params["weights"]
    bn_pack = params["bn_pack"]

    return pl.pallas_call(
        fused_mlp_kernel,
        out_shape=jax.ShapeDtypeStruct((batch_pad, _HEAD_PAD), jnp.float32),
        in_specs=[_vmem_spec()] * 7,
        out_specs=_vmem_spec(),
        # At n_units=2048 add:
        # compiler_params=pltpu.CompilerParams(vmem_limit_bytes=48 << 20),
    )(x2d_bf16, w1, w2, w3, w4, wf, bn_pack)


def init_params(key, n_in=784, n_units=256, n_out=10, n_hidden_layers=_N_HIDDEN):
    """Deterministic parameter init (PyTorch-style uniform fan-in bounds).

    Weights stored in bf16 (MXU-native). All BN affine params + final bias are
    packed into ONE f32 array. w1 is zero-padded along K to _IN_PAD; the final
    weight/bias are zero-padded to a lane-dense width of 128.
    """
    assert n_units >= _HEAD_PAD and n_units % 128 == 0

    weights = []
    dims_in = [n_in] + [n_units] * (n_hidden_layers - 1)
    for li, d_in in enumerate(dims_in):
        key, kw = jax.random.split(key)
        bound = 1.0 / (d_in ** 0.5)
        w = jax.random.uniform(kw, (d_in, n_units), jnp.float32, -bound, bound)
        if li == 0:
            # Zero-pad the input-feature (K) axis: 784 -> 896. Math unchanged.
            w = jnp.zeros((_IN_PAD, n_units), jnp.float32).at[:n_in, :].set(w)
        weights.append(w.astype(jnp.bfloat16))

    key, kw, kb = jax.random.split(key, 3)
    bound = 1.0 / (n_units ** 0.5)
    w_f = jax.random.uniform(kw, (n_units, n_out), jnp.float32, -bound, bound)
    b_f = jax.random.uniform(kb, (n_out,), jnp.float32, -bound, bound)
    # Zero-pad the head to 128 lanes for an unmasked, lane-dense store.
    w_f_pad = jnp.zeros((n_units, _HEAD_PAD), jnp.float32).at[:, :n_out].set(w_f)
    weights.append(w_f_pad.astype(jnp.bfloat16))

    # Coalesced BN(+final bias) parameter pack: (2*L + 1, n_units) f32.
    bn_pack = jnp.zeros((2 * n_hidden_layers + 1, n_units), jnp.float32)
    for i in range(n_hidden_layers):
        bn_pack = bn_pack.at[2 * i, :].set(1.0)      # gamma = 1
        # beta (row 2*i+1) stays 0
    bn_pack = bn_pack.at[2 * n_hidden_layers, :n_out].set(b_f)

    return {"weights": tuple(weights), "bn_pack": bn_pack}


def make_forward(n_in=784, n_out=10):
    """Returns a jitted forward fn; n_in / n_out / batch are static closures."""

    @jax.jit
    def dnn_forward(x, params):
        # x: NCHW (B, 1, 28, 28) -> (B, 784), same as x.view(x.size(0), -1)
        b = x.shape[0]
        h = x.reshape(b, -1).astype(jnp.bfloat16)
        # Lane-align the feature axis (zero columns match zero rows of w1).
        h = jnp.pad(h, ((0, 0), (0, _IN_PAD - n_in)))
        # Tile the batch (exact duplication) up to a multiple of 16 so bf16
        # activation vregs are full. Duplicating the whole batch keeps the BN
        # batch mean and biased variance exactly the same.
        if b % _SUBLANE_PACK != 0 and _SUBLANE_PACK % b == 0:
            h = jnp.tile(h, (_SUBLANE_PACK // b, 1))
        out_padded = fused_forward_call(h, params)
        return out_padded[:b, :n_out]   # static slice (b, n_out are Python ints)

    return dnn_forward


def _reference_forward(x, params, n_in=784, n_out=10):
    """Pure-JAX reference with the same (bf16) params as the kernel.
    (Validates the kernel, not an f32 PyTorch baseline — see header note.)"""
    b = x.shape[0]
    h = x.reshape(b, -1).astype(jnp.bfloat16)
    h = jnp.pad(h, ((0, 0), (0, _IN_PAD - n_in)))
    weights = params["weights"]
    bn = params["bn_pack"]
    for i in range(_N_HIDDEN):
        z = jnp.dot(h, weights[i], preferred_element_type=jnp.float32)
        mean = jnp.mean(z, axis=0, keepdims=True)
        var = jnp.mean((z - mean) ** 2, axis=0, keepdims=True)
        gamma = bn[2 * i: 2 * i + 1, :]
        beta = bn[2 * i + 1: 2 * i + 2, :]
        y = (z - mean) * jax.lax.rsqrt(var + _BN_EPS) * gamma + beta
        h = jnp.tanh(y).astype(jnp.bfloat16)
    out = jnp.dot(h, weights[-1], preferred_element_type=jnp.float32)
    out = out + bn[2 * _N_HIDDEN: 2 * _N_HIDDEN + 1, :_HEAD_PAD]
    return out[:, :n_out]


if __name__ == "__main__":
    key = jax.random.PRNGKey(0)
    key, k_x, k_p = jax.random.split(key, 3)

    batch = 8
    n_units = 256
    n_out = 10

    x = jax.random.normal(k_x, (batch, 1, 28, 28), jnp.float32)  # NCHW like PyTorch
    params = init_params(k_p, n_in=784, n_units=n_units, n_out=n_out,
                         n_hidden_layers=_N_HIDDEN)

    dnn_forward = make_forward(n_in=784, n_out=n_out)
    out = dnn_forward(x, params)
    out = jax.block_until_ready(out)

    ref = _reference_forward(x, params, n_in=784, n_out=n_out)
    assert out.shape == (batch, n_out), out.shape
    assert bool(jnp.allclose(out, ref, atol=2e-2, rtol=2e-2)), "mismatch vs reference"

    print("KERNEL_OK")
</pallas_src>

<mosaic_0001>
module attributes {stable_mosaic.version = 11 : i64} {
  func.func @fused_mlp_kernel(%arg0: memref<16x896xbf16, #tpu.memory_space<vmem>>, %arg1: memref<896x256xbf16, #tpu.memory_space<vmem>>, %arg2: memref<256x256xbf16, #tpu.memory_space<vmem>>, %arg3: memref<256x256xbf16, #tpu.memory_space<vmem>>, %arg4: memref<256x256xbf16, #tpu.memory_space<vmem>>, %arg5: memref<256x128xbf16, #tpu.memory_space<vmem>>, %arg6: memref<9x256xf32, #tpu.memory_space<vmem>>, %arg7: memref<16x128xf32, #tpu.memory_space<vmem>>) attributes {dimension_semantics = [], scalar_prefetch = 0 : i64, scratch_operands = 0 : i64, tpu.core_type = #tpu.core_type<tc>} {
    %c0 = arith.constant 0 : index
    %c0_0 = arith.constant 0 : index
    %0 = vector.load %arg6[%c0, %c0_0] : memref<9x256xf32, #tpu.memory_space<vmem>>, vector<9x256xf32>
    %c0_1 = arith.constant 0 : index
    %c0_2 = arith.constant 0 : index
    %1 = vector.load %arg0[%c0_1, %c0_2] : memref<16x896xbf16, #tpu.memory_space<vmem>>, vector<16x896xbf16>
    %c0_3 = arith.constant 0 : index
    %c0_4 = arith.constant 0 : index
    %2 = vector.load %arg1[%c0_3, %c0_4] : memref<896x256xbf16, #tpu.memory_space<vmem>>, vector<896x256xbf16>
    %cst = arith.constant dense<0.000000e+00> : vector<16x256xf32>
    %3 = tpu.matmul %1, %2, %cst {dimension_numbers = #tpu.dot_dimension_numbers<[1], [0], [0], [1], [0, 0, 1, 1], [], []>} : vector<16x896xbf16>, vector<896x256xbf16>, vector<16x256xf32> -> vector<16x256xf32>
    %cst_5 = arith.constant dense<0.000000e+00> : vector<256xf32>
    %4 = vector.multi_reduction <add>, %3, %cst_5 [0] : vector<16x256xf32> to vector<256xf32>
    %5 = vector.shape_cast %4 : vector<256xf32> to vector<1x256xf32>
    %cst_6 = arith.constant 1.600000e+01 : f32
    %6 = vector.broadcast %cst_6 : f32 to vector<1x256xf32>
    %7 = arith.divf %5, %6 : vector<1x256xf32>
    %8 = vector.broadcast %7 : vector<1x256xf32> to vector<16x256xf32>
    %9 = arith.subf %3, %8 : vector<16x256xf32>
    %10 = arith.mulf %9, %9 : vector<16x256xf32>
    %cst_7 = arith.constant dense<0.000000e+00> : vector<256xf32>
    %11 = vector.multi_reduction <add>, %10, %cst_7 [0] : vector<16x256xf32> to vector<256xf32>
    %12 = vector.shape_cast %11 : vector<256xf32> to vector<1x256xf32>
    %cst_8 = arith.constant 1.600000e+01 : f32
    %13 = vector.broadcast %cst_8 : f32 to vector<1x256xf32>
    %14 = arith.divf %12, %13 : vector<1x256xf32>
    %15 = vector.extract_strided_slice %0 {offsets = [0, 0], sizes = [1, 256], strides = [1, 1]} : vector<9x256xf32> to vector<1x256xf32>
    %16 = vector.extract_strided_slice %0 {offsets = [1, 0], sizes = [1, 256], strides = [1, 1]} : vector<9x256xf32> to vector<1x256xf32>
    %cst_9 = arith.constant 9.99999974E-6 : f32
    %17 = vector.broadcast %cst_9 : f32 to vector<1x256xf32>
    %18 = arith.addf %14, %17 : vector<1x256xf32>
    %19 = math.rsqrt %18 : vector<1x256xf32>
    %20 = arith.mulf %15, %19 : vector<1x256xf32>
    %21 = arith.mulf %7, %20 : vector<1x256xf32>
    %22 = arith.subf %16, %21 : vector<1x256xf32>
    %23 = vector.broadcast %20 : vector<1x256xf32> to vector<16x256xf32>
    %24 = arith.mulf %3, %23 : vector<16x256xf32>
    %25 = vector.broadcast %22 : vector<1x256xf32> to vector<16x256xf32>
    %26 = arith.addf %24, %25 : vector<16x256xf32>
    %27 = math.tanh %26 : vector<16x256xf32>
    %28 = arith.truncf %27 : vector<16x256xf32> to vector<16x256xbf16>
    %c0_10 = arith.constant 0 : index
    %c0_11 = arith.constant 0 : index
    %29 = vector.load %arg2[%c0_10, %c0_11] : memref<256x256xbf16, #tpu.memory_space<vmem>>, vector<256x256xbf16>
    %cst_12 = arith.constant dense<0.000000e+00> : vector<16x256xf32>
    %30 = tpu.matmul %28, %29, %cst_12 {dimension_numbers = #tpu.dot_dimension_numbers<[1], [0], [0], [1], [0, 0, 1, 1], [], []>} : vector<16x256xbf16>, vector<256x256xbf16>, vector<16x256xf32> -> vector<16x256xf32>
    %cst_13 = arith.constant dense<0.000000e+00> : vector<256xf32>
    %31 = vector.multi_reduction <add>, %30, %cst_13 [0] : vector<16x256xf32> to vector<256xf32>
    %32 = vector.shape_cast %31 : vector<256xf32> to vector<1x256xf32>
    %cst_14 = arith.constant 1.600000e+01 : f32
    %33 = vector.broadcast %cst_14 : f32 to vector<1x256xf32>
    %34 = arith.divf %32, %33 : vector<1x256xf32>
    %35 = vector.broadcast %34 : vector<1x256xf32> to vector<16x256xf32>
    %36 = arith.subf %30, %35 : vector<16x256xf32>
    %37 = arith.mulf %36, %36 : vector<16x256xf32>
    %cst_15 = arith.constant dense<0.000000e+00> : vector<256xf32>
    %38 = vector.multi_reduction <add>, %37, %cst_15 [0] : vector<16x256xf32> to vector<256xf32>
    %39 = vector.shape_cast %38 : vector<256xf32> to vector<1x256xf32>
    %cst_16 = arith.constant 1.600000e+01 : f32
    %40 = vector.broadcast %cst_16 : f32 to vector<1x256xf32>
    %41 = arith.divf %39, %40 : vector<1x256xf32>
    %42 = vector.extract_strided_slice %0 {offsets = [2, 0], sizes = [1, 256], strides = [1, 1]} : vector<9x256xf32> to vector<1x256xf32>
    %43 = vector.extract_strided_slice %0 {offsets = [3, 0], sizes = [1, 256], strides = [1, 1]} : vector<9x256xf32> to vector<1x256xf32>
    %cst_17 = arith.constant 9.99999974E-6 : f32
    %44 = vector.broadcast %cst_17 : f32 to vector<1x256xf32>
    %45 = arith.addf %41, %44 : vector<1x256xf32>
    %46 = math.rsqrt %45 : vector<1x256xf32>
    %47 = arith.mulf %42, %46 : vector<1x256xf32>
    %48 = arith.mulf %34, %47 : vector<1x256xf32>
    %49 = arith.subf %43, %48 : vector<1x256xf32>
    %50 = vector.broadcast %47 : vector<1x256xf32> to vector<16x256xf32>
    %51 = arith.mulf %30, %50 : vector<16x256xf32>
    %52 = vector.broadcast %49 : vector<1x256xf32> to vector<16x256xf32>
    %53 = arith.addf %51, %52 : vector<16x256xf32>
    %54 = math.tanh %53 : vector<16x256xf32>
    %55 = arith.truncf %54 : vector<16x256xf32> to vector<16x256xbf16>
    %c0_18 = arith.constant 0 : index
    %c0_19 = arith.constant 0 : index
    %56 = vector.load %arg3[%c0_18, %c0_19] : memref<256x256xbf16, #tpu.memory_space<vmem>>, vector<256x256xbf16>
    %cst_20 = arith.constant dense<0.000000e+00> : vector<16x256xf32>
    %57 = tpu.matmul %55, %56, %cst_20 {dimension_numbers = #tpu.dot_dimension_numbers<[1], [0], [0], [1], [0, 0, 1, 1], [], []>} : vector<16x256xbf16>, vector<256x256xbf16>, vector<16x256xf32> -> vector<16x256xf32>
    %cst_21 = arith.constant dense<0.000000e+00> : vector<256xf32>
    %58 = vector.multi_reduction <add>, %57, %cst_21 [0] : vector<16x256xf32> to vector<256xf32>
    %59 = vector.shape_cast %58 : vector<256xf32> to vector<1x256xf32>
    %cst_22 = arith.constant 1.600000e+01 : f32
    %60 = vector.broadcast %cst_22 : f32 to vector<1x256xf32>
    %61 = arith.divf %59, %60 : vector<1x256xf32>
    %62 = vector.broadcast %61 : vector<1x256xf32> to vector<16x256xf32>
    %63 = arith.subf %57, %62 : vector<16x256xf32>
    %64 = arith.mulf %63, %63 : vector<16x256xf32>
    %cst_23 = arith.constant dense<0.000000e+00> : vector<256xf32>
    %65 = vector.multi_reduction <add>, %64, %cst_23 [0] : vector<16x256xf32> to vector<256xf32>
    %66 = vector.shape_cast %65 : vector<256xf32> to vector<1x256xf32>
    %cst_24 = arith.constant 1.600000e+01 : f32
    %67 = vector.broadcast %cst_24 : f32 to vector<1x256xf32>
    %68 = arith.divf %66, %67 : vector<1x256xf32>
    %69 = vector.extract_strided_slice %0 {offsets = [4, 0], sizes = [1, 256], strides = [1, 1]} : vector<9x256xf32> to vector<1x256xf32>
    %70 = vector.extract_strided_slice %0 {offsets = [5, 0], sizes = [1, 256], strides = [1, 1]} : vector<9x256xf32> to vector<1x256xf32>
    %cst_25 = arith.constant 9.99999974E-6 : f32
    %71 = vector.broadcast %cst_25 : f32 to vector<1x256xf32>
    %72 = arith.addf %68, %71 : vector<1x256xf32>
    %73 = math.rsqrt %72 : vector<1x256xf32>
    %74 = arith.mulf %69, %73 : vector<1x256xf32>
    %75 = arith.mulf %61, %74 : vector<1x256xf32>
    %76 = arith.subf %70, %75 : vector<1x256xf32>
    %77 = vector.broadcast %74 : vector<1x256xf32> to vector<16x256xf32>
    %78 = arith.mulf %57, %77 : vector<16x256xf32>
    %79 = vector.broadcast %76 : vector<1x256xf32> to vector<16x256xf32>
    %80 = arith.addf %78, %79 : vector<16x256xf32>
    %81 = math.tanh %80 : vector<16x256xf32>
    %82 = arith.truncf %81 : vector<16x256xf32> to vector<16x256xbf16>
    %c0_26 = arith.constant 0 : index
    %c0_27 = arith.constant 0 : index
    %83 = vector.load %arg4[%c0_26, %c0_27] : memref<256x256xbf16, #tpu.memory_space<vmem>>, vector<256x256xbf16>
    %cst_28 = arith.constant dense<0.000000e+00> : vector<16x256xf32>
    %84 = tpu.matmul %82, %83, %cst_28 {dimension_numbers = #tpu.dot_dimension_numbers<[1], [0], [0], [1], [0, 0, 1, 1], [], []>} : vector<16x256xbf16>, vector<256x256xbf16>, vector<16x256xf32> -> vector<16x256xf32>
    %cst_29 = arith.constant dense<0.000000e+00> : vector<256xf32>
    %85 = vector.multi_reduction <add>, %84, %cst_29 [0] : vector<16x256xf32> to vector<256xf32>
    %86 = vector.shape_cast %85 : vector<256xf32> to vector<1x256xf32>
    %cst_30 = arith.constant 1.600000e+01 : f32
    %87 = vector.broadcast %cst_30 : f32 to vector<1x256xf32>
    %88 = arith.divf %86, %87 : vector<1x256xf32>
    %89 = vector.broadcast %88 : vector<1x256xf32> to vector<16x256xf32>
    %90 = arith.subf %84, %89 : vector<16x256xf32>
    %91 = arith.mulf %90, %90 : vector<16x256xf32>
    %cst_31 = arith.constant dense<0.000000e+00> : vector<256xf32>
    %92 = vector.multi_reduction <add>, %91, %cst_31 [0] : vector<16x256xf32> to vector<256xf32>
    %93 = vector.shape_cast %92 : vector<256xf32> to vector<1x256xf32>
    %cst_32 = arith.constant 1.600000e+01 : f32
    %94 = vector.broadcast %cst_32 : f32 to vector<1x256xf32>
    %95 = arith.divf %93, %94 : vector<1x256xf32>
    %96 = vector.extract_strided_slice %0 {offsets = [6, 0], sizes = [1, 256], strides = [1, 1]} : vector<9x256xf32> to vector<1x256xf32>
    %97 = vector.extract_strided_slice %0 {offsets = [7, 0], sizes = [1, 256], strides = [1, 1]} : vector<9x256xf32> to vector<1x256xf32>
    %cst_33 = arith.constant 9.99999974E-6 : f32
    %98 = vector.broadcast %cst_33 : f32 to vector<1x256xf32>
    %99 = arith.addf %95, %98 : vector<1x256xf32>
    %100 = math.rsqrt %99 : vector<1x256xf32>
    %101 = arith.mulf %96, %100 : vector<1x256xf32>
    %102 = arith.mulf %88, %101 : vector<1x256xf32>
    %103 = arith.subf %97, %102 : vector<1x256xf32>
    %104 = vector.broadcast %101 : vector<1x256xf32> to vector<16x256xf32>
    %105 = arith.mulf %84, %104 : vector<16x256xf32>
    %106 = vector.broadcast %103 : vector<1x256xf32> to vector<16x256xf32>
    %107 = arith.addf %105, %106 : vector<16x256xf32>
    %108 = math.tanh %107 : vector<16x256xf32>
    %109 = arith.truncf %108 : vector<16x256xf32> to vector<16x256xbf16>
    %110 = vector.extract_strided_slice %0 {offsets = [8, 0], sizes = [1, 128], strides = [1, 1]} : vector<9x256xf32> to vector<1x128xf32>
    %c0_34 = arith.constant 0 : index
    %c0_35 = arith.constant 0 : index
    %111 = vector.load %arg5[%c0_34, %c0_35] : memref<256x128xbf16, #tpu.memory_space<vmem>>, vector<256x128xbf16>
    %cst_36 = arith.constant dense<0.000000e+00> : vector<16x128xf32>
    %112 = tpu.matmul %109, %111, %cst_36 {dimension_numbers = #tpu.dot_dimension_numbers<[1], [0], [0], [1], [0, 0, 1, 1], [], []>} : vector<16x256xbf16>, vector<256x128xbf16>, vector<16x128xf32> -> vector<16x128xf32>
    %113 = vector.broadcast %110 : vector<1x128xf32> to vector<16x128xf32>
    %114 = arith.addf %112, %113 : vector<16x128xf32>
    %c0_37 = arith.constant 0 : index
    %c0_38 = arith.constant 0 : index
    %115 = vector.load %arg7[%c0_37, %c0_38] : memref<16x128xf32, #tpu.memory_space<vmem>>, vector<16x128xf32>
    tpu.vector_store %arg7[%c0_37, %c0_38], %114 {strides = array<i32>} : memref<16x128xf32, #tpu.memory_space<vmem>>, vector<16x128xf32>,
    return
  }
}

</mosaic_0001>

<bundles_post_ra>
// kernel: dnn_forward.1
= control target key start
LH: loop header
LB: loop body
LE: loop exit
PB: predicated region body
PF: predicated region fallthrough
CT: control target
= control target key end

     0   :  { %12 = vsyncpa [#allocation3], 0  ;;  %s4287_s0 = inlined_call_operand.vmem [shape: bf16[16,896], index: 0, kind: input, shape index: {}]   ;;  %s4288_s1 = inlined_call_operand.hbm [shape: bf16[896,256], index: 1, kind: input, shape index: {}]   ;;  %s4289_s2 = inlined_call_operand.vmem [shape: bf16[256,256], index: 2, kind: input, shape index: {}]   ;;  %s4290_s3 = inlined_call_operand.vmem [shape: bf16[256,256], index: 3, kind: input, shape index: {}]   ;;  %s4291_s4 = inlined_call_operand.hbm [shape: bf16[256,256], index: 4, kind: input, shape index: {}]   ;;  %s4292_s5 = inlined_call_operand.vmem [shape: bf16[256,128], index: 5, kind: input, shape index: {}]   ;;  %s4293_s6 = inlined_call_operand.hbm [shape: f32[9,256], index: 6, kind: input, shape index: {}]   ;;  %s4294_s7 = inlined_call_operand.vmem [shape: f32[16,128], index: 7, kind: output, shape index: {}]  }
   0x1   :  { %13 = vsyncpa [#allocation5], 0  ;;  %s37_s26 = sshll.u32 %s4291_s4, 4  ;;  %s3564_s27 = smov [#allocation4]   ;;  %s38_s26 = int_to_ptr.hbm [resolvable:$true] %s37_s26 }
   0x2   :  { %s39_s28 = sshll.u32 %s3564_s27, 4  ;;  %s20_s8 = sshll.u32 %s4288_s1, 4  ;;  %s40_s28 = int_to_ptr.vmem [resolvable:$true] %s39_s28  ;;  %s21_s8 = int_to_ptr.hbm [resolvable:$true] %s20_s8 }
   0x3   :  { %s3565_s9 = smov 128   ;;  %s3566_s10 = smov 8  }
   0x4   :  { %45 = dma.hbm_to_vmem [thread:$0]  %s38_s26, 4096, %s40_s28, [#allocation5], %s3565_s9, %s3565_s9, %s3566_s10  }
   0x5   :  { %s3567_s11 = smov [#allocation2]   ;;  %s52_s15 = sshll.u32 %s4293_s6, 4  ;;  %s53_s15 = int_to_ptr.hbm [resolvable:$true] %s52_s15 }
   0x6   :  { %s22_s12 = sshll.u32 %s3567_s11, 4  ;;  %s3568_s4 = smov [#allocation6]   ;;  %s23_s12 = int_to_ptr.vmem [resolvable:$true] %s22_s12 }
   0x7   :  { %28 = dma.hbm_to_vmem [thread:$0]  %s21_s8, 14336, %s23_s12, [#allocation3], %s3565_s9, %s3565_s9, %s3566_s10  }
   0x8   :  { %s54_s16 = sshll.u32 %s3568_s4, 4  ;;  %s3569_s17 = smov 256   ;;  %s55_s16 = int_to_ptr.vmem [resolvable:$true] %s54_s16 }
   0x9   :  { %s3570_s18 = smov 16  }
   0xa   :  { %60 = dma.hbm_to_vmem [thread:$0]  %s53_s15, 512, %s55_s16, [#allocation5], %s3569_s17, %s3569_s17, %s3570_s18  }
   0xb   :  { %3560 = dma.done.wait [#allocation3], 14336  }
   0xc   :  { %3561 = vsyncadd [#allocation3], 4294952960 }
   0xd   :  { %3562 = dma.done.wait [#allocation5], 4608  }
   0xe   :  { %3563 = vsyncadd [#allocation5], 4294962688  ;;  %v2358_v0 = vld [vmem:[#allocation2 + $0x70] sm:$0xf]  ;;  %v3218_v1 = vld [vmem:[#allocation2 + $0x74] sm:$0xf0] }
   0xf   :  { %v2422_v2 = vld [vmem:[#allocation2 + $0xf0] sm:$0xf]  ;;  %v2359_v3 = vor.u32 %v3218_v1, %v2358_v0  ;;  %v3234_v4 = vld [vmem:[#allocation2 + $0xf4] sm:$0xf0]  ;;  %v2350_v11 = vld [vmem:[#allocation2 + $0x60] sm:$0xf] }
  0x10   :  { %v2486_v5 = vld [vmem:[#allocation2 + $0x170] sm:$0xf]  ;;  %v3250_v6 = vld [vmem:[#allocation2 + $0x174] sm:$0xf0]  ;;  %v2423_v7 = vor.u32 %v3234_v4, %v2422_v2  ;;  %v3216_v13 = vld [vmem:[#allocation2 + $0x64] sm:$0xf0] }
  0x11   :  { %v2487_v8 = vor.u32 %v3250_v6, %v2486_v5  ;;  %v2550_v9 = vld [vmem:[#allocation2 + $0x1f0] sm:$0xf]  ;;  %v3266_v10 = vld [vmem:[#allocation2 + $0x1f4] sm:$0xf0]  ;;  %792 = vmatpush.bf16.msra.mxu0 %v2359_v3  ;;  %v2414_v14 = vld [vmem:[#allocation2 + $0xe0] sm:$0xf]  ;;  %v2351_v16 = vor.u32 %v3216_v13, %v2350_v11 }
  0x12   :  { %v2551_v12 = vor.u32 %v3266_v10, %v2550_v9  ;;  %v3232_v15 = vld [vmem:[#allocation2 + $0xe4] sm:$0xf0]  ;;  %806 = vmatpush.bf16.msra.mxu1 %v2423_v7  ;;  %v2478_v18 = vld [vmem:[#allocation2 + $0x160] sm:$0xf]  ;;  %v2342_v23 = vld [vmem:[#allocation2 + $0x50] sm:$0xf] }
  0x13   :  { %820 = vmatpush.bf16.msra.mxu2 %v2487_v8  ;;  %v2415_v17 = vor.u32 %v3232_v15, %v2414_v14  ;;  %v3248_v19 = vld [vmem:[#allocation2 + $0x164] sm:$0xf0]  ;;  %v2542_v20 = vld [vmem:[#allocation2 + $0x1e0] sm:$0xf]  ;;  %v3214_v24 = vld [vmem:[#allocation2 + $0x54] sm:$0xf0] }
  0x14   :  { %834 = vmatpush.bf16.msra.mxu3 %v2551_v12  ;;  %v2479_v21 = vor.u32 %v3248_v19, %v2478_v18  ;;  %v3264_v22 = vld [vmem:[#allocation2 + $0x1e4] sm:$0xf0]  ;;  %v2406_v26 = vld [vmem:[#allocation2 + $0xd0] sm:$0xf]  ;;  %v3230_v27 = vld [vmem:[#allocation2 + $0xd4] sm:$0xf0]  ;;  %v2343_v29 = vor.u32 %v3214_v24, %v2342_v23 }
  0x15   :  { %v2543_v25 = vor.u32 %v3264_v22, %v2542_v20  ;;  %v2470_v28 = vld [vmem:[#allocation2 + $0x150] sm:$0xf]  ;;  %793 = vmatpush.bf16.msra.mxu0 %v2351_v16  ;;  %v3246_v30 = vld [vmem:[#allocation2 + $0x154] sm:$0xf0]  ;;  %v2407_v33 = vor.u32 %v3230_v27, %v2406_v26  ;;  %v2334_v35 = vld [vmem:[#allocation2 + $0x40] sm:$0xf] }
  0x16   :  { %v2534_v31 = vld [vmem:[#allocation2 + $0x1d0] sm:$0xf]  ;;  %v3262_v32 = vld [vmem:[#allocation2 + $0x1d4] sm:$0xf0]  ;;  %807 = vmatpush.bf16.msra.mxu1 %v2415_v17  ;;  %v2471_v34 = vor.u32 %v3246_v30, %v2470_v28  ;;  %v3212_v36 = vld [vmem:[#allocation2 + $0x44] sm:$0xf0] }
  0x17   :  { %821 = vmatpush.bf16.msra.mxu2 %v2479_v21  ;;  %v2398_v37 = vld [vmem:[#allocation2 + $0xc0] sm:$0xf]  ;;  %v2535_v38 = vor.u32 %v3262_v32, %v2534_v31  ;;  %v3228_v39 = vld [vmem:[#allocation2 + $0xc4] sm:$0xf0]  ;;  %v2335_v44 = vor.u32 %v3212_v36, %v2334_v35  ;;  %v2326_v47 = vld [vmem:[#allocation2 + $0x30] sm:$0xf] }
  0x18   :  { %835 = vmatpush.bf16.msra.mxu3 %v2543_v25  ;;  %v2462_v40 = vld [vmem:[#allocation2 + $0x140] sm:$0xf]  ;;  %v3244_v41 = vld [vmem:[#allocation2 + $0x144] sm:$0xf0]  ;;  %v2399_v45 = vor.u32 %v3228_v39, %v2398_v37  ;;  %v3210_v48 = vld [vmem:[#allocation2 + $0x34] sm:$0xf0] }
  0x19   :  { %v2526_v42 = vld [vmem:[#allocation2 + $0x1c0] sm:$0xf]  ;;  %v3260_v43 = vld [vmem:[#allocation2 + $0x1c4] sm:$0xf0]  ;;  %794 = vmatpush.bf16.msra.mxu0 %v2343_v29  ;;  %v2463_v46 = vor.u32 %v3244_v41, %v2462_v40  ;;  %v2390_v49 = vld [vmem:[#allocation2 + $0xb0] sm:$0xf]  ;;  %v2327_v56 = vor.u32 %v3210_v48, %v2326_v47 }
  0x1a   :  { %808 = vmatpush.bf16.msra.mxu1 %v2407_v33  ;;  %v2527_v50 = vor.u32 %v3260_v43, %v2526_v42  ;;  %v3226_v51 = vld [vmem:[#allocation2 + $0xb4] sm:$0xf0]  ;;  %v2454_v52 = vld [vmem:[#allocation2 + $0x130] sm:$0xf]  ;;  %v2318_v59 = vld [vmem:[#allocation2 + $0x20] sm:$0xf] }
  0x1b   :  { %822 = vmatpush.bf16.msra.mxu2 %v2471_v34  ;;  %v3242_v53 = vld [vmem:[#allocation2 + $0x134] sm:$0xf0]  ;;  %v2518_v54 = vld [vmem:[#allocation2 + $0x1b0] sm:$0xf]  ;;  %v2391_v57 = vor.u32 %v3226_v51, %v2390_v49  ;;  %v3208_v60 = vld [vmem:[#allocation2 + $0x24] sm:$0xf0] }
  0x1c   :  { %836 = vmatpush.bf16.msra.mxu3 %v2535_v38  ;;  %v3258_v55 = vld [vmem:[#allocation2 + $0x1b4] sm:$0xf0]  ;;  %v2455_v58 = vor.u32 %v3242_v53, %v2454_v52  ;;  %v2382_v61 = vld [vmem:[#allocation2 + $0xa0] sm:$0xf]  ;;  %v3224_v63 = vld [vmem:[#allocation2 + $0xa4] sm:$0xf0]  ;;  %v2319_v4 = vor.u32 %v3208_v60, %v2318_v59 }
  0x1d   :  { %795 = vmatpush.bf16.msra.mxu0 %v2335_v44  ;;  %v2519_v62 = vor.u32 %v3258_v55, %v2518_v54  ;;  %v2446_v0 = vld [vmem:[#allocation2 + $0x120] sm:$0xf]  ;;  %v3240_v1 = vld [vmem:[#allocation2 + $0x124] sm:$0xf0]  ;;  %v2383_v5 = vor.u32 %v3224_v63, %v2382_v61  ;;  %v2310_v7 = vld [vmem:[#allocation2 + $0x10] sm:$0xf] }
  0x1e   :  { %809 = vmatpush.bf16.msra.mxu1 %v2399_v45  ;;  %v2510_v2 = vld [vmem:[#allocation2 + $0x1a0] sm:$0xf]  ;;  %v3256_v3 = vld [vmem:[#allocation2 + $0x1a4] sm:$0xf0]  ;;  %v2447_v6 = vor.u32 %v3240_v1, %v2446_v0  ;;  %v3206_v8 = vld [vmem:[#allocation2 + $0x14] sm:$0xf0] }
  0x1f   :  { %823 = vmatpush.bf16.msra.mxu2 %v2463_v46  ;;  %v2374_v9 = vld [vmem:[#allocation2 + $0x90] sm:$0xf]  ;;  %v2511_v10 = vor.u32 %v3256_v3, %v2510_v2  ;;  %v3222_v11 = vld [vmem:[#allocation2 + $0x94] sm:$0xf0]  ;;  %v2311_v16 = vor.u32 %v3206_v8, %v2310_v7  ;;  %v2302_v17 = vld [vmem:[#allocation2] sm:$0xf] }
  0x20   :  { %837 = vmatpush.bf16.msra.mxu3 %v2527_v50  ;;  %v2438_v12 = vld [vmem:[#allocation2 + $0x110] sm:$0xf]  ;;  %v3238_v13 = vld [vmem:[#allocation2 + $0x114] sm:$0xf0]  ;;  %v3204_v18 = vld [vmem:[#allocation2 + $0x4] sm:$0xf0]  ;;  %v2375_v19 = vor.u32 %v3222_v11, %v2374_v9 }
  0x21   :  { %796 = vmatpush.bf16.msra.mxu0 %v2327_v56  ;;  %v2502_v14 = vld [vmem:[#allocation2 + $0x190] sm:$0xf]  ;;  %v3254_v15 = vld [vmem:[#allocation2 + $0x194] sm:$0xf0]  ;;  %v2439_v20 = vor.u32 %v3238_v13, %v2438_v12  ;;  %v2366_v21 = vld [vmem:[#allocation2 + $0x80] sm:$0xf]  ;;  %v2303_v31 = vor.u32 %v3204_v18, %v2302_v17 }
  0x22   :  { %810 = vmatpush.bf16.msra.mxu1 %v2391_v57  ;;  %v3220_v22 = vld [vmem:[#allocation2 + $0x84] sm:$0xf0]  ;;  %v2430_v23 = vld [vmem:[#allocation2 + $0x100] sm:$0xf]  ;;  %v2503_v24 = vor.u32 %v3254_v15, %v2502_v14  ;;  %v2614_v26 = vld [vmem:[#allocation2 + $0x270] sm:$0xf] }
  0x23   :  { %824 = vmatpush.bf16.msra.mxu2 %v2455_v58  ;;  %v3236_v25 = vld [vmem:[#allocation2 + $0x104] sm:$0xf0]  ;;  %v3282_v27 = vld [vmem:[#allocation2 + $0x274] sm:$0xf0]  ;;  %v2678_v28 = vld [vmem:[#allocation2 + $0x2f0] sm:$0xf]  ;;  %v2367_v35 = vor.u32 %v3220_v22, %v2366_v21 }
  0x24   :  { %838 = vmatpush.bf16.msra.mxu3 %v2519_v62  ;;  %v3298_v29 = vld [vmem:[#allocation2 + $0x2f4] sm:$0xf0]  ;;  %v2742_v30 = vld [vmem:[#allocation2 + $0x370] sm:$0xf]  ;;  %v2494_v33 = vld [vmem:[#allocation2 + $0x180] sm:$0xf]  ;;  %v2431_v36 = vor.u32 %v3236_v25, %v2430_v23  ;;  %v2615_v39 = vor.u32 %v3282_v27, %v2614_v26 }
  0x25   :  { %797 = vmatpush.bf16.msra.mxu0 %v2319_v4  ;;  %v3314_v32 = vld [vmem:[#allocation2 + $0x374] sm:$0xf0]  ;;  %v3252_v34 = vld [vmem:[#allocation2 + $0x184] sm:$0xf0]  ;;  %v3217_v37 = vld [vmem:[#allocation2 + $0x74] sm:$0xf]  ;;  %v2679_v40 = vor.u32 %v3298_v29, %v2678_v28 }
  0x26   :  { %811 = vmatpush.bf16.msra.mxu1 %v2383_v5  ;;  %v2360_v38 = vld [vmem:[#allocation2 + $0x78] sm:$0xf0]  ;;  %v2606_v41 = vld [vmem:[#allocation2 + $0x260] sm:$0xf]  ;;  %v3280_v42 = vld [vmem:[#allocation2 + $0x264] sm:$0xf0]  ;;  %v2743_v44 = vor.u32 %v3314_v32, %v2742_v30  ;;  %v2495_v45 = vor.u32 %v3252_v34, %v2494_v33 }
  0x27   :  { %825 = vmatpush.bf16.msra.mxu2 %v2447_v6  ;;  %v2670_v43 = vld [vmem:[#allocation2 + $0x2e0] sm:$0xf]  ;;  %v3296_v46 = vld [vmem:[#allocation2 + $0x2e4] sm:$0xf0]  ;;  %v2363_v49 = vor.u32 %v3217_v37, %v2360_v38  ;;  %v3215_v50 = vld [vmem:[#allocation2 + $0x64] sm:$0xf]  ;;  %v2607_v57 = vor.u32 %v3280_v42, %v2606_v41 }
  0x28   :  { %839 = vmatpush.bf16.msra.mxu3 %v2511_v10  ;;  %v2734_v47 = vld [vmem:[#allocation2 + $0x360] sm:$0xf]  ;;  %v3312_v48 = vld [vmem:[#allocation2 + $0x364] sm:$0xf0]  ;;  %v3199_v52 = vld [vmem:[%s4287_s0 + $0x18] sm:$0xf0]  ;;  %v2671_v58 = vor.u32 %v3296_v46, %v2670_v43 }
  0x29   :  { %798 = vmatpush.bf16.msra.mxu0 %v2311_v16  ;;  %v2274_v51 = vld [vmem:[%s4287_s0] sm:$0xf]  ;;  %v2352_v53 = vld [vmem:[#allocation2 + $0x68] sm:$0xf0]  ;;  %v2282_v55 = vld [vmem:[%s4287_s0 + $0x8] sm:$0xf]  ;;  %v2735_v63 = vor.u32 %v3312_v48, %v2734_v47 }
  0x2a   :  { %812 = vmatpush.bf16.msra.mxu1 %v2375_v19  ;;  %v3627_v54 = vor.u32 %v3199_v52, %v2274_v51  ;;  %v3200_v56 = vld [vmem:[%s4287_s0 + $0x20] sm:$0xf0]  ;;  %v2598_v59 = vld [vmem:[#allocation2 + $0x250] sm:$0xf]  ;;  %v3278_v60 = vld [vmem:[#allocation2 + $0x254] sm:$0xf0]  ;;  %v2355_v3 = vor.u32 %v3215_v50, %v2352_v53 }
  0x2b   :  { %826 = vmatpush.bf16.msra.mxu2 %v2439_v20  ;;  %v2662_v61 = vld [vmem:[#allocation2 + $0x2d0] sm:$0xf]  ;;  %v3635_v62 = vor.u32 %v3200_v56, %v2282_v55  ;;  %v3294_v0 = vld [vmem:[#allocation2 + $0x2d4] sm:$0xf0]  ;;  %v3213_v4 = vld [vmem:[#allocation2 + $0x54] sm:$0xf]  ;;  %v2599_v11 = vor.u32 %v3278_v60, %v2598_v59 }
  0x2c   :  { %840 = vmatpush.bf16.msra.mxu3 %v2503_v24  ;;  %v2726_v1 = vld [vmem:[#allocation2 + $0x350] sm:$0xf]  ;;  %v3310_v2 = vld [vmem:[#allocation2 + $0x354] sm:$0xf0]  ;;  %v3196_v5 = vld [vmem:[%s4287_s0 + $0x4] sm:$0xf]  ;;  %v2663_v12 = vor.u32 %v3294_v0, %v2662_v61 }
  0x2d   :  { %799 = vmatpush.bf16.msra.mxu0 %v2303_v31  ;;  %v2276_v6 = vld [vmem:[%s4287_s0 + $0x1c] sm:$0xf0]  ;;  %v2344_v7 = vld [vmem:[#allocation2 + $0x58] sm:$0xf0]  ;;  %v3197_v9 = vld [vmem:[%s4287_s0 + $0xc] sm:$0xf]  ;;  %v2727_v15 = vor.u32 %v3310_v2, %v2726_v1 }
  0x2e   :  { %813 = vmatpush.bf16.msra.mxu1 %v2367_v35  ;;  %v3645_v8 = vor.u32 %v3196_v5, %v2276_v6  ;;  %v2284_v10 = vld [vmem:[%s4287_s0 + $0x24] sm:$0xf0]  ;;  %v2590_v13 = vld [vmem:[#allocation2 + $0x240] sm:$0xf]  ;;  %v2347_v19 = vor.u32 %v3213_v4, %v2344_v7  ;;  %v3211_v22 = vld [vmem:[#allocation2 + $0x44] sm:$0xf] }
  0x2f   :  { %827 = vmatpush.bf16.msra.mxu2 %v2431_v36  ;;  %v3653_v14 = vor.u32 %v3197_v9, %v2284_v10  ;;  %v3276_v16 = vld [vmem:[#allocation2 + $0x244] sm:$0xf0]  ;;  %v2654_v17 = vld [vmem:[#allocation2 + $0x2c0] sm:$0xf]  ;;  %v2336_v23 = vld [vmem:[#allocation2 + $0x48] sm:$0xf0] }
  0x30   :  { %841 = vmatpush.bf16.msra.mxu3 %v2495_v45  ;;  %800 = vmatmul.bf16.vlgmr.msra.gmra.mxu0 %v3627_v54  ;;  %v3292_v18 = vld [vmem:[#allocation2 + $0x2c4] sm:$0xf0]  ;;  %v2718_v20 = vld [vmem:[#allocation2 + $0x340] sm:$0xf]  ;;  %v2591_v24 = vor.u32 %v3276_v16, %v2590_v13  ;;  %v2582_v26 = vld [vmem:[#allocation2 + $0x230] sm:$0xf]  ;;  %v2339_v31 = vor.u32 %v3211_v22, %v2336_v23 }
  0x31   :  { %848 = vmatpush.bf16.msrb.mxu0 %v2615_v39  ;;  %814 = vmatmul.bf16.vlgmr.msra.gmra.mxu1 %v3645_v8  ;;  %v3308_v21 = vld [vmem:[#allocation2 + $0x344] sm:$0xf0]  ;;  %v2655_v25 = vor.u32 %v3292_v18, %v2654_v17  ;;  %v3274_v28 = vld [vmem:[#allocation2 + $0x234] sm:$0xf0]  ;;  %v2646_v29 = vld [vmem:[#allocation2 + $0x2b0] sm:$0xf] }
  0x32   :  { %862 = vmatpush.bf16.msrb.mxu1 %v2679_v40  ;;  %828 = vmatmul.bf16.vlgmr.msra.gmra.mxu2 %v3635_v62  ;;  %v2719_v27 = vor.u32 %v3308_v21, %v2718_v20  ;;  %v3290_v30 = vld [vmem:[#allocation2 + $0x2b4] sm:$0xf0]  ;;  %v2710_v32 = vld [vmem:[#allocation2 + $0x330] sm:$0xf]  ;;  %v3209_v34 = vld [vmem:[#allocation2 + $0x34] sm:$0xf]  ;;  %v2583_v36 = vor.u32 %v3274_v28, %v2582_v26 }
  0x33   :  { %876 = vmatpush.bf16.msrb.mxu2 %v2743_v44  ;;  %842 = vmatmul.bf16.vlgmr.msra.gmra.mxu3 %v3653_v14  ;;  %v3306_v33 = vld [vmem:[#allocation2 + $0x334] sm:$0xf0]  ;;  %v2328_v35 = vld [vmem:[#allocation2 + $0x38] sm:$0xf0]  ;;  %v2647_v37 = vor.u32 %v3290_v30, %v2646_v29  ;;  %v2574_v38 = vld [vmem:[#allocation2 + $0x220] sm:$0xf] }
  0x34   :  { %890 = vmatpush.bf16.msrb.mxu3 %v2363_v49  ;;  %v2711_v39 = vor.u32 %v3306_v33, %v2710_v32  ;;  %v3272_v40 = vld [vmem:[#allocation2 + $0x224] sm:$0xf0]  ;;  %v2638_v41 = vld [vmem:[#allocation2 + $0x2a0] sm:$0xf]  ;;  %v2331_v43 = vor.u32 %v3209_v34, %v2328_v35  ;;  %v3207_v46 = vld [vmem:[#allocation2 + $0x24] sm:$0xf] }
  0x35   :  { %849 = vmatpush.bf16.msrb.mxu0 %v2607_v57  ;;  %v3288_v42 = vld [vmem:[#allocation2 + $0x2a4] sm:$0xf0]  ;;  %v2702_v44 = vld [vmem:[#allocation2 + $0x320] sm:$0xf]  ;;  %v2320_v47 = vld [vmem:[#allocation2 + $0x28] sm:$0xf0]  ;;  %v2575_v48 = vor.u32 %v3272_v40, %v2574_v38 }
  0x36   :  { %863 = vmatpush.bf16.msrb.mxu1 %v2671_v58  ;;  %v3304_v45 = vld [vmem:[#allocation2 + $0x324] sm:$0xf0]  ;;  %v2639_v49 = vor.u32 %v3288_v42, %v2638_v41  ;;  %v2566_v50 = vld [vmem:[#allocation2 + $0x210] sm:$0xf]  ;;  %v3270_v51 = vld [vmem:[#allocation2 + $0x214] sm:$0xf0]  ;;  %v2323_v57 = vor.u32 %v3207_v46, %v2320_v47 }
  0x37   :  { %877 = vmatpush.bf16.msrb.mxu2 %v2735_v63  ;;  %v2703_v52 = vor.u32 %v3304_v45, %v2702_v44  ;;  %v2630_v53 = vld [vmem:[#allocation2 + $0x290] sm:$0xf]  ;;  %v3286_v55 = vld [vmem:[#allocation2 + $0x294] sm:$0xf0]  ;;  %v3205_v59 = vld [vmem:[#allocation2 + $0x14] sm:$0xf]  ;;  %v2567_v2 = vor.u32 %v3270_v51, %v2566_v50 }
  0x38   :  { %891 = vmatpush.bf16.msrb.mxu3 %v2355_v3  ;;  %v2694_v56 = vld [vmem:[#allocation2 + $0x310] sm:$0xf]  ;;  %v3302_v58 = vld [vmem:[#allocation2 + $0x314] sm:$0xf0]  ;;  %v2312_v60 = vld [vmem:[#allocation2 + $0x18] sm:$0xf0]  ;;  %v2631_v3 = vor.u32 %v3286_v55, %v2630_v53 }
  0x39   :  { %850 = vmatpush.bf16.msrb.mxu0 %v2599_v11  ;;  %v2558_v61 = vld [vmem:[#allocation2 + $0x200] sm:$0xf]  ;;  %v3268_v63 = vld [vmem:[#allocation2 + $0x204] sm:$0xf0]  ;;  %v3233_v6 = vld [vmem:[#allocation2 + $0xf4] sm:$0xf]  ;;  %v2695_v7 = vor.u32 %v3302_v58, %v2694_v56 }
  0x3a   :  { %864 = vmatpush.bf16.msrb.mxu1 %v2663_v12  ;;  %v2622_v0 = vld [vmem:[#allocation2 + $0x280] sm:$0xf]  ;;  %v3284_v1 = vld [vmem:[#allocation2 + $0x284] sm:$0xf0]  ;;  %v2424_v9 = vld [vmem:[#allocation2 + $0xf8] sm:$0xf0]  ;;  %v2315_v12 = vor.u32 %v3205_v59, %v2312_v60  ;;  %v2559_v20 = vor.u32 %v3268_v63, %v2558_v61 }
  0x3b   :  { %878 = vmatpush.bf16.msrb.mxu2 %v2727_v15  ;;  %v2686_v4 = vld [vmem:[#allocation2 + $0x300] sm:$0xf]  ;;  %v3300_v5 = vld [vmem:[#allocation2 + $0x304] sm:$0xf0]  ;;  %v3249_v10 = vld [vmem:[#allocation2 + $0x174] sm:$0xf]  ;;  %v2623_v21 = vor.u32 %v3284_v1, %v2622_v0  ;;  %v2427_v26 = vor.u32 %v3233_v6, %v2424_v9 }
  0x3c   :  { %892 = vmatpush.bf16.msrb.mxu3 %v2347_v19  ;;  %v2488_v11 = vld [vmem:[#allocation2 + $0x178] sm:$0xf0]  ;;  %v3265_v13 = vld [vmem:[#allocation2 + $0x1f4] sm:$0xf]  ;;  %v2290_v16 = vld [vmem:[%s4287_s0 + $0x10] sm:$0xf] }
  0x3d   :  { %851 = vmatpush.bf16.msrb.mxu0 %v2591_v24  ;;  %v2552_v15 = vld [vmem:[#allocation2 + $0x1f8] sm:$0xf0]  ;;  %v3201_v17 = vld [vmem:[%s4287_s0 + $0x28] sm:$0xf0]  ;;  %v2298_v18 = vld [vmem:[%s4287_s0 + $0x18] sm:$0xf]  ;;  %v2491_v30 = vor.u32 %v3249_v10, %v2488_v11 }
  0x3e   :  { %865 = vmatpush.bf16.msrb.mxu1 %v2655_v25  ;;  %v3202_v19 = vld [vmem:[%s4287_s0 + $0x30] sm:$0xf0]  ;;  %v3203_v22 = vld [vmem:[#allocation2 + $0x4] sm:$0xf]  ;;  %v2304_v23 = vld [vmem:[#allocation2 + $0x8] sm:$0xf0]  ;;  %v2687_v25 = vor.u32 %v3300_v5, %v2686_v4  ;;  %v3675_v35 = vor.u32 %v3201_v17, %v2290_v16 }
  0x3f   :  { %879 = vmatpush.bf16.msrb.mxu2 %v2719_v27  ;;  %v3281_v24 = vld [vmem:[#allocation2 + $0x274] sm:$0xf]  ;;  %v2616_v27 = vld [vmem:[#allocation2 + $0x278] sm:$0xf0]  ;;  %v2292_v29 = vld [vmem:[%s4287_s0 + $0x2c] sm:$0xf0]  ;;  %v3677_v40 = vor.u32 %v3202_v19, %v2298_v18 }
  0x40   :  { %893 = vmatpush.bf16.msrb.mxu3 %v2339_v31  ;;  %v3198_v28 = vld [vmem:[%s4287_s0 + $0x14] sm:$0xf]  ;;  %v2555_v31 = vor.u32 %v3265_v13, %v2552_v15  ;;  %v3231_v32 = vld [vmem:[#allocation2 + $0xe4] sm:$0xf]  ;;  %v2416_v33 = vld [vmem:[#allocation2 + $0xe8] sm:$0xf0]  ;;  %v2619_v41 = vor.u32 %v3281_v24, %v2616_v27 }
  0x41   :  { %852 = vmatpush.bf16.msrb.mxu0 %v2583_v36  ;;  %v3247_v34 = vld [vmem:[#allocation2 + $0x164] sm:$0xf]  ;;  %v2307_v36 = vor.u32 %v3203_v22, %v2304_v23  ;;  %v3679_v42 = vor.u32 %v3198_v28, %v2292_v29  ;;  %v2608_v45 = vld [vmem:[#allocation2 + $0x268] sm:$0xf0]  ;;  %v3245_v50 = vld [vmem:[#allocation2 + $0x154] sm:$0xf] }
  0x42   :  { %866 = vmatpush.bf16.msrb.mxu1 %v2647_v37  ;;  %v2480_v37 = vld [vmem:[#allocation2 + $0x168] sm:$0xf0]  ;;  %v3263_v38 = vld [vmem:[#allocation2 + $0x1e4] sm:$0xf]  ;;  %v2472_v51 = vld [vmem:[#allocation2 + $0x158] sm:$0xf0] }
  0x43   :  { %880 = vmatpush.bf16.msrb.mxu2 %v2711_v39  ;;  %v2544_v39 = vld [vmem:[#allocation2 + $0x1e8] sm:$0xf0]  ;;  %v3279_v44 = vld [vmem:[#allocation2 + $0x264] sm:$0xf]  ;;  %v2483_v46 = vor.u32 %v3247_v34, %v2480_v37  ;;  %v2536_v53 = vld [vmem:[#allocation2 + $0x1d8] sm:$0xf0]  ;;  %v2475_v59 = vor.u32 %v3245_v50, %v2472_v51 }
  0x44   :  { %894 = vmatpush.bf16.msrb.mxu3 %v2331_v43  ;;  %v2419_v43 = vor.u32 %v3231_v32, %v2416_v33  ;;  %v2547_v47 = vor.u32 %v3263_v38, %v2544_v39  ;;  %v2611_v55 = vor.u32 %v3279_v44, %v2608_v45  ;;  %v2600_v58 = vld [vmem:[#allocation2 + $0x258] sm:$0xf0]  ;;  %v3227_v61 = vld [vmem:[#allocation2 + $0xc4] sm:$0xf]  ;;  %v2400_v63 = vld [vmem:[#allocation2 + $0xc8] sm:$0xf0] }
  0x45   :  { %853 = vmatpush.bf16.msrb.mxu0 %v2575_v48  ;;  %v3229_v48 = vld [vmem:[#allocation2 + $0xd4] sm:$0xf]  ;;  %v3243_v0 = vld [vmem:[#allocation2 + $0x144] sm:$0xf]  ;;  %v2464_v1 = vld [vmem:[#allocation2 + $0x148] sm:$0xf0]  ;;  %v2403_v5 = vor.u32 %v3227_v61, %v2400_v63 }
  0x46   :  { %867 = vmatpush.bf16.msrb.mxu1 %v2639_v49  ;;  %v2408_v49 = vld [vmem:[#allocation2 + $0xd8] sm:$0xf0]  ;;  %v3275_v6 = vld [vmem:[#allocation2 + $0x244] sm:$0xf]  ;;  %v2467_v9 = vor.u32 %v3243_v0, %v2464_v1  ;;  %v3225_v11 = vld [vmem:[#allocation2 + $0xb4] sm:$0xf] }
  0x47   :  { %881 = vmatpush.bf16.msrb.mxu2 %v2703_v52  ;;  %v3261_v52 = vld [vmem:[#allocation2 + $0x1d4] sm:$0xf]  ;;  %v2411_v56 = vor.u32 %v3229_v48, %v2408_v49  ;;  %v2456_v15 = vld [vmem:[#allocation2 + $0x138] sm:$0xf0]  ;;  %v2384_v24 = vld [vmem:[#allocation2 + $0xa8] sm:$0xf0] }
  0x48   :  { %895 = vmatpush.bf16.msrb.mxu3 %v2323_v57  ;;  %v3277_v57 = vld [vmem:[#allocation2 + $0x254] sm:$0xf]  ;;  %v2539_v60 = vor.u32 %v3261_v52, %v2536_v53  ;;  %v2520_v17 = vld [vmem:[#allocation2 + $0x1b8] sm:$0xf0]  ;;  %v3255_v27 = vld [vmem:[#allocation2 + $0x1a4] sm:$0xf] }
  0x49   :  { %854 = vmatpush.bf16.msrb.mxu0 %v2567_v2  ;;  %v3259_v2 = vld [vmem:[#allocation2 + $0x1c4] sm:$0xf]  ;;  %v2603_v4 = vor.u32 %v3277_v57, %v2600_v58  ;;  %v3241_v13 = vld [vmem:[#allocation2 + $0x134] sm:$0xf]  ;;  %v2512_v28 = vld [vmem:[#allocation2 + $0x1a8] sm:$0xf0] }
  0x4a   :  { %868 = vmatpush.bf16.msrb.mxu1 %v2631_v3  ;;  %v2528_v3 = vld [vmem:[#allocation2 + $0x1c8] sm:$0xf0]  ;;  %v3257_v16 = vld [vmem:[#allocation2 + $0x1b4] sm:$0xf]  ;;  %v2459_v22 = vor.u32 %v3241_v13, %v2456_v15  ;;  %v2515_v34 = vor.u32 %v3255_v27, %v2512_v28  ;;  %v2376_v37 = vld [vmem:[#allocation2 + $0x98] sm:$0xf0] }
  0x4b   :  { %882 = vmatpush.bf16.msrb.mxu2 %v2695_v7  ;;  %v2592_v7 = vld [vmem:[#allocation2 + $0x248] sm:$0xf0]  ;;  %v2531_v10 = vor.u32 %v3259_v2, %v2528_v3  ;;  %v3273_v19 = vld [vmem:[#allocation2 + $0x234] sm:$0xf]  ;;  %v2523_v23 = vor.u32 %v3257_v16, %v2520_v17  ;;  %v2440_v39 = vld [vmem:[#allocation2 + $0x118] sm:$0xf0] }
  0x4c   :  { %896 = vmatpush.bf16.msrb.mxu3 %v2315_v12  ;;  %v2392_v12 = vld [vmem:[#allocation2 + $0xb8] sm:$0xf0]  ;;  %v2595_v18 = vor.u32 %v3275_v6, %v2592_v7  ;;  %v2576_v32 = vld [vmem:[#allocation2 + $0x228] sm:$0xf0]  ;;  %v3237_v38 = vld [vmem:[#allocation2 + $0x114] sm:$0xf] }
  0x4d   :  { %855 = vmatpush.bf16.msrb.mxu0 %v2559_v20  ;;  %v2584_v20 = vld [vmem:[#allocation2 + $0x238] sm:$0xf0]  ;;  %v3219_v48 = vld [vmem:[#allocation2 + $0x84] sm:$0xf]  ;;  %v2443_v49 = vor.u32 %v3237_v38, %v2440_v39  ;;  %v2368_v51 = vld [vmem:[#allocation2 + $0x88] sm:$0xf0] }
  0x4e   :  { %869 = vmatpush.bf16.msrb.mxu1 %v2623_v21  ;;  %v3223_v21 = vld [vmem:[#allocation2 + $0xa4] sm:$0xf]  ;;  %v2587_v29 = vor.u32 %v3273_v19, %v2584_v20  ;;  %v2432_v53 = vld [vmem:[#allocation2 + $0x108] sm:$0xf0]  ;;  %v3297_v57 = vld [vmem:[#allocation2 + $0x2f4] sm:$0xf]  ;;  %v2371_v63 = vor.u32 %v3219_v48, %v2368_v51 }
  0x4f   :  { %883 = vmatpush.bf16.msrb.mxu2 %v2687_v25  ;;  %v3239_v25 = vld [vmem:[#allocation2 + $0x124] sm:$0xf]  ;;  %v2744_v61 = vld [vmem:[#allocation2 + $0x378] sm:$0xf0]  ;;  %v2560_v1 = vld [vmem:[#allocation2 + $0x208] sm:$0xf0] }
  0x50   :  { %856 = vmatmul.bf16.vlgmr.msrb.gmra.mxu0 %v3675_v35  ;;  %897 = vmatpush.bf16.msrb.mxu3 %v2307_v36  ;;  %v3221_v36 = vld [vmem:[#allocation2 + $0x94] sm:$0xf]  ;;  %v3235_v52 = vld [vmem:[#allocation2 + $0x104] sm:$0xf]  ;;  %v2664_v16 = vld [vmem:[#allocation2 + $0x2d8] sm:$0xf0] }
  0x51   :  { %904 = vmatpush.bf16.msra.mxu0 %v2427_v26  ;;  %870 = vmatmul.bf16.vlgmr.msrb.gmra.mxu1 %v3679_v42  ;;  %v2448_v26 = vld [vmem:[#allocation2 + $0x128] sm:$0xf0]  ;;  %v2379_v45 = vor.u32 %v3221_v36, %v2376_v37  ;;  %v3267_v0 = vld [vmem:[#allocation2 + $0x204] sm:$0xf]  ;;  %v2435_v2 = vor.u32 %v3235_v52, %v2432_v53  ;;  %v3293_v15 = vld [vmem:[#allocation2 + $0x2d4] sm:$0xf] }
  0x52   :  { %918 = vmatpush.bf16.msra.mxu1 %v2491_v30  ;;  %884 = vmatmul.bf16.vlgmr.msrb.gmra.mxu2 %v3677_v40  ;;  %v2387_v30 = vor.u32 %v3223_v21, %v2384_v24  ;;  %v2451_v33 = vor.u32 %v3239_v25, %v2448_v26  ;;  %v3295_v6 = vld [vmem:[#allocation2 + $0x2e4] sm:$0xf]  ;;  %v2563_v7 = vor.u32 %v3267_v0, %v2560_v1  ;;  %v3309_v17 = vld [vmem:[#allocation2 + $0x354] sm:$0xf]  ;;  %v2656_v21 = vld [vmem:[#allocation2 + $0x2c8] sm:$0xf0] }
  0x53   :  { %932 = vmatpush.bf16.msra.mxu2 %v2555_v31  ;;  %898 = vmatmul.bf16.vlgmr.msrb.gmra.mxu3 %v3627_v54  ;;  %v2395_v54 = vor.u32 %v3225_v11, %v2392_v12  ;;  %v3271_v31 = vld [vmem:[#allocation2 + $0x224] sm:$0xf]  ;;  %v2736_v11 = vld [vmem:[#allocation2 + $0x368] sm:$0xf0]  ;;  %v3289_v25 = vld [vmem:[#allocation2 + $0x2b4] sm:$0xf] }
  0x54   :  { %946 = vmatpush.bf16.msra.mxu3 %v2619_v41  ;;  %v3253_v41 = vld [vmem:[#allocation2 + $0x194] sm:$0xf]  ;;  %v2579_v44 = vor.u32 %v3271_v31, %v2576_v32  ;;  %v3291_v20 = vld [vmem:[#allocation2 + $0x2c4] sm:$0xf]  ;;  %v2648_v26 = vld [vmem:[#allocation2 + $0x2b8] sm:$0xf0] }
  0x55   :  { %905 = vmatpush.bf16.msra.mxu0 %v2419_v43  ;;  %v2504_v43 = vld [vmem:[#allocation2 + $0x198] sm:$0xf0]  ;;  %v3305_v27 = vld [vmem:[#allocation2 + $0x334] sm:$0xf]  ;;  %v3303_v31 = vld [vmem:[#allocation2 + $0x324] sm:$0xf] }
  0x56   :  { %919 = vmatpush.bf16.msra.mxu1 %v2483_v46  ;;  %v3269_v46 = vld [vmem:[#allocation2 + $0x214] sm:$0xf]  ;;  %v2507_v50 = vor.u32 %v3253_v41, %v2504_v43  ;;  %v2704_v32 = vld [vmem:[#allocation2 + $0x328] sm:$0xf0]  ;;  %v2632_v36 = vld [vmem:[#allocation2 + $0x298] sm:$0xf0] }
  0x57   :  { %933 = vmatpush.bf16.msra.mxu2 %v2547_v47  ;;  %v2568_v47 = vld [vmem:[#allocation2 + $0x218] sm:$0xf0]  ;;  %v3301_v37 = vld [vmem:[#allocation2 + $0x314] sm:$0xf]  ;;  %v3283_v43 = vld [vmem:[#allocation2 + $0x284] sm:$0xf] }
  0x58   :  { %947 = vmatpush.bf16.msra.mxu3 %v2611_v55  ;;  %v3251_v55 = vld [vmem:[#allocation2 + $0x184] sm:$0xf]  ;;  %v2571_v58 = vor.u32 %v3269_v46, %v2568_v47  ;;  %v2696_v38 = vld [vmem:[#allocation2 + $0x318] sm:$0xf0]  ;;  %v2688_v46 = vld [vmem:[#allocation2 + $0x308] sm:$0xf0] }
  0x59   :  { %906 = vmatpush.bf16.msra.mxu0 %v2411_v56  ;;  %v2496_v56 = vld [vmem:[#allocation2 + $0x188] sm:$0xf0]  ;;  %v2699_v41 = vor.u32 %v3301_v37, %v2696_v38  ;;  %v3571_v1 = vmov 16.0  }
  0x5a   :  { %920 = vmatpush.bf16.msra.mxu1 %v2475_v59  ;;  %v2680_v59 = vld [vmem:[#allocation2 + $0x2f8] sm:$0xf0]  ;;  %v2499_v3 = vor.u32 %v3251_v55, %v2496_v56  ;;  %3436 = vrcp.f32 %v3571_v1  ;;  %v2800_v37 = vld [vmem:[%s4289_s2 + $0x68] sm:$0xf0]  ;;  %v2774_v1 = vld [vmem:[%s4289_s2 + $0x30] sm:$0xf] }
  0x5b   :  { %934 = vmatpush.bf16.msra.mxu2 %v2539_v60  ;;  %v3313_v60 = vld [vmem:[#allocation2 + $0x374] sm:$0xf] }
  0x5c   :  { %948 = vmatpush.bf16.msra.mxu3 %v2603_v4  ;;  %v2683_v4 = vor.u32 %v3297_v57, %v2680_v59 }
  0x5d   :  { %907 = vmatpush.bf16.msra.mxu0 %v2403_v5  ;;  %v2747_v5 = vor.u32 %v3313_v60, %v2744_v61 }
  0x5e   :  { %921 = vmatpush.bf16.msra.mxu1 %v2467_v9  ;;  %v2672_v9 = vld [vmem:[#allocation2 + $0x2e8] sm:$0xf0] }
  0x5f   :  { %935 = vmatpush.bf16.msra.mxu2 %v2531_v10  ;;  %v3311_v10 = vld [vmem:[#allocation2 + $0x364] sm:$0xf]  ;;  %v2675_v12 = vor.u32 %v3295_v6, %v2672_v9 }
  0x60   :  { %949 = vmatpush.bf16.msra.mxu3 %v2595_v18  ;;  %v2739_v13 = vor.u32 %v3311_v10, %v2736_v11  ;;  %v2728_v18 = vld [vmem:[#allocation2 + $0x358] sm:$0xf0] }
  0x61   :  { %908 = vmatpush.bf16.msra.mxu0 %v2395_v54  ;;  %v2667_v54 = vor.u32 %v3293_v15, %v2664_v16  ;;  %v2731_v19 = vor.u32 %v3309_v17, %v2728_v18 }
  0x62   :  { %922 = vmatpush.bf16.msra.mxu1 %v2459_v22  ;;  %v3307_v22 = vld [vmem:[#allocation2 + $0x344] sm:$0xf] }
  0x63   :  { %936 = vmatpush.bf16.msra.mxu2 %v2523_v23  ;;  %v2720_v23 = vld [vmem:[#allocation2 + $0x348] sm:$0xf0] }
  0x64   :  { %950 = vmatpush.bf16.msra.mxu3 %v2587_v29  ;;  %v2723_v24 = vor.u32 %v3307_v22, %v2720_v23  ;;  %v3287_v29 = vld [vmem:[#allocation2 + $0x2a4] sm:$0xf] }
  0x65   :  { %909 = vmatpush.bf16.msra.mxu0 %v2387_v30  ;;  %v2640_v30 = vld [vmem:[#allocation2 + $0x2a8] sm:$0xf0] }
  0x66   :  { %923 = vmatpush.bf16.msra.mxu1 %v2451_v33  ;;  %v2707_v33 = vor.u32 %v3303_v31, %v2704_v32 }
  0x67   :  { %937 = vmatpush.bf16.msra.mxu2 %v2515_v34  ;;  %v3285_v34 = vld [vmem:[#allocation2 + $0x294] sm:$0xf] }
  0x68   :  { %951 = vmatpush.bf16.msra.mxu3 %v2579_v44  ;;  %v2635_v39 = vor.u32 %v3285_v34, %v2632_v36  ;;  %v2624_v44 = vld [vmem:[#allocation2 + $0x288] sm:$0xf0]  ;;  %v3327_v34 = vld [vmem:[%s4289_s2 + $0x64] sm:$0xf] }
  0x69   :  { %910 = vmatpush.bf16.msra.mxu0 %v2379_v45  ;;  %v3299_v45 = vld [vmem:[#allocation2 + $0x304] sm:$0xf]  ;;  %v2627_v47 = vor.u32 %v3283_v43, %v2624_v44  ;;  %v2790_v44 = vld [vmem:[%s4289_s2 + $0x50] sm:$0xf] }
  0x6a   :  { %924 = vmatpush.bf16.msra.mxu1 %v2443_v49  ;;  %v2691_v48 = vor.u32 %v3299_v45, %v2688_v46  ;;  %v3326_v45 = vld [vmem:[%s4289_s2 + $0x54] sm:$0xf0]  ;;  %v3325_v46 = vld [vmem:[%s4289_s2 + $0x54] sm:$0xf] }
  0x6b   :  { %938 = vmatpush.bf16.msra.mxu2 %v2507_v50 }
  0x6c   :  { %952 = vmatpush.bf16.msra.mxu3 %v2571_v58 }
  0x6d   :  { %911 = vmatpush.bf16.msra.mxu0 %v2371_v63 }
  0x6e   :  { %925 = vmatpush.bf16.msra.mxu1 %v2435_v2 }
  0x6f   :  { %939 = vmatpush.bf16.msra.mxu2 %v2499_v3 }
  0x70   :  { %953 = vmatpush.bf16.msra.mxu3 %v2563_v7  ;;  %912 = vmatmul.bf16.vlgmr.msra.gmra.mxu0 %v3645_v8  ;;  %v2659_v8 = vor.u32 %v3291_v20, %v2656_v21 }
  0x71   :  { %960 = vmatpush.bf16.msrb.mxu0 %v2683_v4  ;;  %926 = vmatmul.bf16.vlgmr.msra.gmra.mxu1 %v3635_v62  ;;  %v2651_v62 = vor.u32 %v3289_v25, %v2648_v26  ;;  %v2806_v25 = vld [vmem:[%s4289_s2 + $0x70] sm:$0xf]  ;;  %v3330_v26 = vld [vmem:[%s4289_s2 + $0x74] sm:$0xf0] }
  0x72   :  { %974 = vmatpush.bf16.msrb.mxu1 %v2747_v5  ;;  %940 = vmatmul.bf16.vlgmr.msra.gmra.mxu2 %v3653_v14  ;;  %v2712_v14 = vld [vmem:[#allocation2 + $0x338] sm:$0xf0]  ;;  %v3437_v5 = vpop.eup %3436 }
  0x73   :  { %954 = vmatmul.bf16.vlgmr.msra.gmra.mxu3 %v3675_v35  ;;  %v2715_v28 = vor.u32 %v3305_v27, %v2712_v14  ;;  %v2643_v35 = vor.u32 %v3287_v29, %v2640_v30  ;;  %v1003_v10 = vmul.f32 16.0, %v3437_v5  ;;  %vm1007_vm0 = vweird.f32 %v3437_v5  ;;  %v3329_v27 = vld [vmem:[%s4289_s2 + $0x74] sm:$0xf] }
  0x74   :  { %v2807_v14 = vor.u32 %v3330_v26, %v2806_v25  ;;  %v3318_v25 = vld [vmem:[%s4289_s2 + $0x14] sm:$0xf0] }
  0x75   :  { %961 = vmatpush.bf16.msrb.mxu0 %v2675_v12  ;;  %v1004_v16 = vsub.f32 1.0, %v1003_v10  ;;  %v3320_v10 = vld [vmem:[%s4289_s2 + $0x24] sm:$0xf0] }
  0x76   :  { %975 = vmatpush.bf16.msrb.mxu1 %v2739_v13  ;;  %1279 = vmatpush.bf16.msrb.mxu2 %v2807_v14  ;;  %v2760_v14 = vld [vmem:[%s4289_s2 + $0x18] sm:$0xf0] }
  0x79   :  { %962 = vmatpush.bf16.msrb.mxu0 %v2667_v54  ;;  %v1005_v54 = vmul.f32 %v3437_v5, %v1004_v16 }
  0x7a   :  { %976 = vmatpush.bf16.msrb.mxu1 %v2731_v19 }
  0x7b   :  { %v1006_v21 = vadd.f32 %v3437_v5, %v1005_v54 }
  0x7d   :  { %963 = vmatpush.bf16.msrb.mxu0 %v2659_v8  ;;  %v3697_v8 = vsel %vm1007_vm0, %v3437_v5, %v1006_v21 }
  0x7e   :  { %977 = vmatpush.bf16.msrb.mxu1 %v2723_v24 }
  0x81   :  { %964 = vmatpush.bf16.msrb.mxu0 %v2651_v62  ;;  %v2808_v62 = vld [vmem:[%s4289_s2 + $0x78] sm:$0xf0] }
  0x82   :  { %978 = vmatpush.bf16.msrb.mxu1 %v2715_v28  ;;  %v2811_v29 = vor.u32 %v3329_v27, %v2808_v62  ;;  %v3317_v27 = vld [vmem:[%s4289_s2 + $0x14] sm:$0xf] }
  0x85   :  { %965 = vmatpush.bf16.msrb.mxu0 %v2643_v35  ;;  %v2798_v35 = vld [vmem:[%s4289_s2 + $0x60] sm:$0xf] }
  0x86   :  { %979 = vmatpush.bf16.msrb.mxu1 %v2707_v33  ;;  %v3328_v33 = vld [vmem:[%s4289_s2 + $0x64] sm:$0xf0] }
  0x87   :  { %v2799_v36 = vor.u32 %v3328_v33, %v2798_v35  ;;  %v3316_v35 = vld [vmem:[%s4289_s2 + $0x4] sm:$0xf0]  ;;  %v3315_v33 = vld [vmem:[%s4289_s2 + $0x4] sm:$0xf] }
  0x89   :  { %966 = vmatpush.bf16.msrb.mxu0 %v2635_v39  ;;  %1280 = vmatpush.bf16.msrb.mxu2 %v2799_v36 }
  0x8a   :  { %980 = vmatpush.bf16.msrb.mxu1 %v2699_v41  ;;  %v2803_v41 = vor.u32 %v3327_v34, %v2800_v37 }
  0x8d   :  { %967 = vmatpush.bf16.msrb.mxu0 %v2627_v47  ;;  %v2791_v47 = vor.u32 %v3326_v45, %v2790_v44 }
  0x8e   :  { %981 = vmatpush.bf16.msrb.mxu1 %v2691_v48  ;;  %v2792_v48 = vld [vmem:[%s4289_s2 + $0x58] sm:$0xf0] }
  0x8f   :  { %1281 = vmatpush.bf16.msrb.mxu2 %v2791_v47 }
  0x90   :  { %968 = vmatmul.bf16.vlgmr.msrb.gmra.mxu0 %v3679_v42 }
  0x91   :  { %982 = vmatmul.bf16.vlgmr.msrb.gmra.mxu1 %v3677_v40  ;;  %1307 = vmatpush.bf16.msra.mxu0 %v2811_v29  ;;  %v2763_v29 = vor.u32 %v3317_v27, %v2760_v14  ;;  %v2864_v27 = vld [vmem:[%s4289_s2 + $0xe8] sm:$0xf0] }
  0x95   :  { %1308 = vmatpush.bf16.msra.mxu0 %v2803_v41 }
  0xad   :  { %v801_v49 = vpop.f32.mrf.mxu0 }
  0xae   :  { %v815_v50 = vpop.f32.mrf.mxu1 }
  0xaf   :  { %v816_v56 = vadd.f32 %v815_v50, %v801_v49  ;;  %v2795_v50 = vor.u32 %v3325_v46, %v2792_v48 }
  0xb1   :  { %1309 = vmatpush.bf16.msra.mxu0 %v2795_v50 }
  0xb5   :  { %v829_v51 = vpop.f32.mrf.mxu2  ;;  %v803_v52 = vpop.f32.mrf.mxu0 }
  0xb6   :  { %v817_v53 = vpop.f32.mrf.mxu1  ;;  %v843_v55 = vpop.f32.mrf.mxu3  ;;  %v830_v58 = vadd.f32 %v829_v51, %v816_v56  ;;  %v3324_v56 = vld [vmem:[%s4289_s2 + $0x44] sm:$0xf0] }
  0xb7   :  { %v818_v59 = vadd.f32 %v817_v53, %v803_v52 }
  0xb8   :  { %v844_v63 = vadd.f32 %v843_v55, %v830_v58  ;;  %v2782_v55 = vld [vmem:[%s4289_s2 + $0x40] sm:$0xf] }
  0xbd   :  { %v831_v57 = vpop.f32.mrf.mxu2 }
  0xbe   :  { %v832_v0 = vadd.f32 %v831_v57, %v818_v59  ;;  %v845_v2 = vpop.f32.mrf.mxu3  ;;  %v3323_v57 = vld [vmem:[%s4289_s2 + $0x44] sm:$0xf]  ;;  %v2783_v59 = vor.u32 %v3324_v56, %v2782_v55 }
  0xc0   :  { %v846_v40 = vadd.f32 %v845_v2, %v832_v0  ;;  %1282 = vmatpush.bf16.msrb.mxu2 %v2783_v59  ;;  %v3322_v2 = vld [vmem:[%s4289_s2 + $0x34] sm:$0xf0]  ;;  %v3807_v59 = vld [vmem:[#allocation6] sm:$0xff] }
  0xcd   :  { %v857_v60 = vpop.f32.mrf.mxu0 }
  0xce   :  { %v871_v61 = vpop.f32.mrf.mxu1  ;;  %v858_v3 = vadd.f32 %v857_v60, %v844_v63  ;;  %v2784_v60 = vld [vmem:[%s4289_s2 + $0x48] sm:$0xf0] }
  0xcf   :  { %v2787_v63 = vor.u32 %v3323_v57, %v2784_v60 }
  0xd0   :  { %v872_v9 = vadd.f32 %v871_v61, %v858_v3  ;;  %v2775_v3 = vor.u32 %v3322_v2, %v2774_v1 }
  0xd1   :  { %1310 = vmatpush.bf16.msra.mxu0 %v2787_v63 }
  0xd2   :  { %1283 = vmatpush.bf16.msrb.mxu2 %v2775_v3 }
  0xd5   :  { %v885_v42 = vpop.f32.mrf.mxu2  ;;  %v859_v4 = vpop.f32.mrf.mxu0 }
  0xd6   :  { %v860_v6 = vadd.f32 %v859_v4, %v846_v40  ;;  %v873_v7 = vpop.f32.mrf.mxu1  ;;  %v3691_v13 = vadd.f32 %v885_v42, %v872_v9  ;;  %v899_v30 = vpop.f32.mrf.mxu3  ;;  %v3321_v42 = vld [vmem:[%s4289_s2 + $0x34] sm:$0xf]  ;;  %v2776_v40 = vld [vmem:[%s4289_s2 + $0x38] sm:$0xf0]  ;;  %v2766_v9 = vld [vmem:[%s4289_s2 + $0x20] sm:$0xf] }
  0xd8   :  { %v874_v11 = vadd.f32 %v873_v7, %v860_v6  ;;  %v2779_v6 = vor.u32 %v3321_v42, %v2776_v40 }
  0xda   :  { %1311 = vmatpush.bf16.msra.mxu0 %v2779_v6 }
  0xdd   :  { %v887_v12 = vpop.f32.mrf.mxu2 }
  0xde   :  { %v3693_v15 = vadd.f32 %v887_v12, %v874_v11  ;;  %v901_v58 = vpop.f32.mrf.mxu3  ;;  %v3319_v11 = vld [vmem:[%s4289_s2 + $0x24] sm:$0xf] }
  0xe0   :  { %v988_v17 = vadd.f32 %v3693_v15, %v3691_v13 }
  0xe2   :  { %v989_v18 = vrot.slane %v988_v17, 4 }
  0xe4   :  { %v990_v19 = vadd.f32 %v989_v18, %v988_v17  ;;  %v2767_v17 = vor.u32 %v3320_v10, %v2766_v9  ;;  %v2768_v18 = vld [vmem:[%s4289_s2 + $0x28] sm:$0xf0] }
  0xe6   :  { %v991_v20 = vrot.slane %v990_v19, 2  ;;  %1284 = vmatpush.bf16.msrb.mxu2 %v2767_v17 }
  0xe8   :  { %v992_v22 = vadd.f32 %v991_v20, %v990_v19  ;;  %v2771_v20 = vor.u32 %v3319_v11, %v2768_v18  ;;  %v3346_v18 = vld [vmem:[%s4289_s2 + $0xf4] sm:$0xf0] }
  0xea   :  { %v993_v23 = vrot.slane %v992_v22, 1  ;;  %1312 = vmatpush.bf16.msra.mxu0 %v2771_v20 }
  0xec   :  { %v994_v24 = vadd.f32 %v993_v23, %v992_v22 }
  0xed   :  { %v913_v51 = vpop.f32.mrf.mxu0 }
  0xee   :  { %v3712_v28 = vmul.f32 %v3697_v8, %v994_v24  ;;  %v927_v52 = vpop.f32.mrf.mxu1  ;;  %v914_v19 = vadd.f32 %v913_v51, %v899_v30  ;;  %v2758_v24 = vld [vmem:[%s4289_s2 + $0x10] sm:$0xf]  ;;  %1313 = vmatpush.bf16.msra.mxu0 %v2763_v29 }
  0xef   :  { %v2759_v26 = vor.u32 %v3318_v25, %v2758_v24  ;;  %v3344_v24 = vld [vmem:[%s4289_s2 + $0xe4] sm:$0xf0]  ;;  %v3343_v25 = vld [vmem:[%s4289_s2 + $0xe4] sm:$0xf] }
  0xf0   :  { %v1011_v31 = vsub.f32 %v3691_v13, %v3712_v28  ;;  %v1013_v32 = vsub.f32 %v3693_v15, %v3712_v28  ;;  %v928_v62 = vadd.f32 %v927_v52, %v914_v19  ;;  %v2867_v29 = vor.u32 %v3343_v25, %v2864_v27  ;;  %v3920_v25 = vld [vmem:[#allocation6 + $0x8] sm:$0xff] }
  0xf1   :  { %1285 = vmatpush.bf16.msrb.mxu2 %v2759_v26 }
  0xf2   :  { %v1015_v38 = vmul.f32 %v1011_v31, %v1011_v31  ;;  %v1017_v39 = vmul.f32 %v1013_v32, %v1013_v32  ;;  %v2750_v32 = vld [vmem:[%s4289_s2] sm:$0xf] }
  0xf3   :  { %v2751_v37 = vor.u32 %v3316_v35, %v2750_v32  ;;  %v2854_v32 = vld [vmem:[%s4289_s2 + $0xd0] sm:$0xf]  ;;  %v3342_v35 = vld [vmem:[%s4289_s2 + $0xd4] sm:$0xf0] }
  0xf4   :  { %v1019_v43 = vadd.f32 %v1017_v39, %v1015_v38  ;;  %v2752_v38 = vld [vmem:[%s4289_s2 + $0x8] sm:$0xf0] }
  0xf5   :  { %v941_v5 = vpop.f32.mrf.mxu2  ;;  %v915_v12 = vpop.f32.mrf.mxu0  ;;  %v2755_v41 = vor.u32 %v3315_v33, %v2752_v38  ;;  %1286 = vmatpush.bf16.msrb.mxu2 %v2751_v37  ;;  %v3341_v33 = vld [vmem:[%s4289_s2 + $0xd4] sm:$0xf]  ;;  %v2856_v37 = vld [vmem:[%s4289_s2 + $0xd8] sm:$0xf0] }
  0xf6   :  { %v1020_v49 = vrot.slane %v1019_v43, 4  ;;  %v929_v16 = vpop.f32.mrf.mxu1  ;;  %v955_v21 = vpop.f32.mrf.mxu3  ;;  %v916_v23 = vadd.f32 %v915_v12, %v901_v58  ;;  %v942_v39 = vadd.f32 %v941_v5, %v928_v62 }
  0xf7   :  { %1314 = vmatpush.bf16.msra.mxu0 %v2755_v41  ;;  %v2859_v41 = vor.u32 %v3341_v33, %v2856_v37 }
  0xf8   :  { %v1021_v53 = vadd.f32 %v1020_v49, %v1019_v43  ;;  %v930_v30 = vadd.f32 %v929_v16, %v916_v23  ;;  %v956_v47 = vadd.f32 %v955_v21, %v942_v39  ;;  %v2862_v23 = vld [vmem:[%s4289_s2 + $0xe0] sm:$0xf] }
  0xf9   :  { %v2863_v26 = vor.u32 %v3344_v24, %v2862_v23 }
  0xfa   :  { %v1022_v61 = vrot.slane %v1021_v53, 2 }
  0xfc   :  { %v1023_v0 = vadd.f32 %v1022_v61, %v1021_v53 }
  0xfd   :  { %v943_v31 = vpop.f32.mrf.mxu2 }
  0xfe   :  { %v1024_v4 = vrot.slane %v1023_v0, 1  ;;  %v944_v44 = vadd.f32 %v943_v31, %v930_v30  ;;  %v957_v46 = vpop.f32.mrf.mxu3 }
 0x100   :  { %v1025_v7 = vadd.f32 %v1024_v4, %v1023_v0  ;;  %v958_v49 = vadd.f32 %v957_v46, %v944_v44  ;;  %v2846_v44 = vld [vmem:[%s4289_s2 + $0xc0] sm:$0xf]  ;;  %v3339_v46 = vld [vmem:[%s4289_s2 + $0xc4] sm:$0xf] }
 0x102   :  { %v1033_v54 = vmul.f32 %v1025_v7, %v3697_v8 }
 0x104   :  { %v1035_v22 = vadd.f32 1e-05, %v1033_v54  ;;  %v3345_v54 = vld [vmem:[%s4289_s2 + $0xf4] sm:$0xf] }
 0x106   :  { %3438 = vrsqrt.f32 %v1035_v22  ;;  %vm1043_vm2 = vweird.f32 %v1035_v22 }
 0x10c   :  { %v3439_v43 = vpop.eup %3438 }
 0x10d   :  { %v969_v34 = vpop.f32.mrf.mxu0  ;;  %v1038_v45 = vmul.f32 %v3439_v43, %v1035_v22  ;;  %vm1044_vm1 = vweird.f32 %v3439_v43 }
 0x10e   :  { %v983_v36 = vpop.f32.mrf.mxu1  ;;  %v970_v50 = vadd.f32 %v969_v34, %v956_v47  ;;  %vm1045_vm3 = vmor %vm1043_vm2, %vm1044_vm1 }
 0x10f   :  { %v1039_v48 = vmul.f32 %v3439_v43, %v1038_v45  ;;  %v3340_v45 = vld [vmem:[%s4289_s2 + $0xc4] sm:$0xf0] }
 0x110   :  { %v3803_v57 = vadd.f32 %v983_v36, %v970_v50  ;;  %v2855_v36 = vor.u32 %v3342_v35, %v2854_v32  ;;  %v2847_v47 = vor.u32 %v3340_v45, %v2846_v44 }
 0x111   :  { %v1040_v51 = vmul.f32 0.5, %v1039_v48  ;;  %v2848_v48 = vld [vmem:[%s4289_s2 + $0xc8] sm:$0xf0] }
 0x112   :  { %v2851_v50 = vor.u32 %v3339_v46, %v2848_v48 }
 0x113   :  { %v1041_v55 = vsub.f32 1.5, %v1040_v51 }
 0x115   :  { %v971_v52 = vpop.f32.mrf.mxu0  ;;  %v1042_v60 = vmul.f32 %v3439_v43, %v1041_v55  ;;  %v3337_v55 = vld [vmem:[%s4289_s2 + $0xb4] sm:$0xf] }
 0x116   :  { %v972_v53 = vadd.f32 %v971_v52, %v958_v49  ;;  %v985_v56 = vpop.f32.mrf.mxu1  ;;  %v2838_v52 = vld [vmem:[%s4289_s2 + $0xb0] sm:$0xf] }
 0x117   :  { %v1046_v63 = vsel %vm1045_vm3, %v3439_v43, %v1042_v60  ;;  %v2840_v60 = vld [vmem:[%s4289_s2 + $0xb8] sm:$0xf0] }
 0x118   :  { %v3805_v58 = vadd.f32 %v985_v56, %v972_v53  ;;  %v1057_v0 = vmul.f32 %v1046_v63, %v3807_v59  ;;  %v3338_v53 = vld [vmem:[%s4289_s2 + $0xb4] sm:$0xf0]  ;;  %v2843_v63 = vor.u32 %v3337_v55, %v2840_v60 }
 0x119   :  { %v2839_v56 = vor.u32 %v3338_v53, %v2838_v52 }
 0x11a   :  { %v995_v61 = vadd.f32 %v3805_v58, %v3803_v57  ;;  %v1059_v2 = vmul.f32 %v1057_v0, %v3712_v28  ;;  %v1069_v40 = vperm.slane %v1057_v0, 0  ;;  %v2870_v28 = vld [vmem:[%s4289_s2 + $0xf0] sm:$0xf] }
 0x11c   :  { %v996_v1 = vrot.slane %v995_v61, 4  ;;  %v1063_v3 = vrot.slane %v1059_v2, 7  ;;  %v1071_v7 = vmul.f32 %v1069_v40, %v3691_v13  ;;  %v1073_v9 = vmul.f32 %v1069_v40, %v3693_v15  ;;  %v2872_v15 = vld [vmem:[%s4289_s2 + $0xf8] sm:$0xf0]  ;;  %v3336_v2 = vld [vmem:[%s4289_s2 + $0xa4] sm:$0xf0] }
 0x11d   :  { %v2871_v13 = vor.u32 %v3346_v18, %v2870_v28  ;;  %v2875_v20 = vor.u32 %v3345_v54, %v2872_v15  ;;  %v2832_v40 = vld [vmem:[%s4289_s2 + $0xa8] sm:$0xf0]  ;;  %v3332_v28 = vld [vmem:[%s4289_s2 + $0x84] sm:$0xf0]  ;;  %v3331_v18 = vld [vmem:[%s4289_s2 + $0x84] sm:$0xf] }
 0x11e   :  { %v997_v42 = vadd.f32 %v996_v1, %v995_v61  ;;  %v1067_v5 = vsub.f32 %v3807_v59, %v1063_v3  ;;  %v2830_v1 = vld [vmem:[%s4289_s2 + $0xa0] sm:$0xf]  ;;  %v2816_v54 = vld [vmem:[%s4289_s2 + $0x88] sm:$0xf0] }
 0x11f   :  { %1293 = vmatpush.bf16.msrb.mxu3 %v2871_v13  ;;  %1321 = vmatpush.bf16.msra.mxu1 %v2875_v20  ;;  %v2831_v3 = vor.u32 %v3336_v2, %v2830_v1  ;;  %v2819_v15 = vor.u32 %v3331_v18, %v2816_v54  ;;  %v3375_v18 = vld [vmem:[%s4290_s3 + $0xe4] sm:$0xf]  ;;  %v2992_v54 = vld [vmem:[%s4290_s3 + $0xe8] sm:$0xf0] }
 0x120   :  { %v998_v4 = vrot.slane %v997_v42, 2  ;;  %v1075_v10 = vperm.slane %v1067_v5, 1 }
 0x122   :  { %v999_v6 = vadd.f32 %v998_v4, %v997_v42  ;;  %v1077_v12 = vadd.f32 %v1075_v10, %v1071_v7  ;;  %v1079_v16 = vadd.f32 %v1075_v10, %v1073_v9  ;;  %v3335_v42 = vld [vmem:[%s4289_s2 + $0xa4] sm:$0xf]  ;;  %v2822_v7 = vld [vmem:[%s4289_s2 + $0x90] sm:$0xf]  ;;  %v3334_v9 = vld [vmem:[%s4289_s2 + $0x94] sm:$0xf0] }
 0x123   :  { %1294 = vmatpush.bf16.msrb.mxu3 %v2863_v26  ;;  %1322 = vmatpush.bf16.msra.mxu1 %v2867_v29  ;;  %v2835_v5 = vor.u32 %v3335_v42, %v2832_v40  ;;  %v2823_v10 = vor.u32 %v3334_v9, %v2822_v7  ;;  %v2998_v42 = vld [vmem:[%s4290_s3 + $0xf0] sm:$0xf] }
 0x124   :  { %v1000_v11 = vrot.slane %v999_v6, 1  ;;  %3440 = vtanh.f32 %v1077_v12  ;;  %v2824_v12 = vld [vmem:[%s4289_s2 + $0x98] sm:$0xf0] }
 0x125   :  { %3442 = vtanh.f32 %v1079_v16  ;;  %v2814_v16 = vld [vmem:[%s4289_s2 + $0x80] sm:$0xf] }
 0x126   :  { %v1001_v17 = vadd.f32 %v1000_v11, %v999_v6  ;;  %v3333_v11 = vld [vmem:[%s4289_s2 + $0x94] sm:$0xf]  ;;  %v2815_v13 = vor.u32 %v3332_v28, %v2814_v16  ;;  %v2990_v16 = vld [vmem:[%s4290_s3 + $0xe0] sm:$0xf] }
 0x127   :  { %1295 = vmatpush.bf16.msrb.mxu3 %v2855_v36  ;;  %1323 = vmatpush.bf16.msra.mxu1 %v2859_v41 }
 0x128   :  { %v3829_v19 = vmul.f32 %v3697_v8, %v1001_v17  ;;  %v2827_v17 = vor.u32 %v3333_v11, %v2824_v12 }
 0x12a   :  { %v1012_v21 = vsub.f32 %v3803_v57, %v3829_v19  ;;  %v1014_v22 = vsub.f32 %v3805_v58, %v3829_v19  ;;  %v3441_v30 = vpop.eup %3440 }
 0x12b   :  { %v3443_v34 = vpop.eup %3442  ;;  %1296 = vmatpush.bf16.msrb.mxu3 %v2847_v47  ;;  %1324 = vmatpush.bf16.msra.mxu1 %v2851_v50 }
 0x12c   :  { %v1016_v14 = vmul.f32 %v1012_v21, %v1012_v21  ;;  %v1018_v62 = vmul.f32 %v1014_v22, %v1014_v22  ;;  %v1085_v39 = vpack.c.bf16 %v3443_v34, %v3441_v30 }
 0x12e   :  { %v1026_v31 = vadd.f32 %v1018_v62, %v1016_v14  ;;  %1287 = vmatmul.bf16.vlgmr.msrb.gmra.mxu2 %v1085_v39  ;;  %1315 = vmatmul.bf16.vlgmr.msra.gmra.mxu0 %v1085_v39 }
 0x12f   :  { %1297 = vmatpush.bf16.msrb.mxu3 %v2839_v56  ;;  %1325 = vmatpush.bf16.msra.mxu1 %v2843_v63 }
 0x130   :  { %v1027_v38 = vrot.slane %v1026_v31, 4 }
 0x132   :  { %v1028_v43 = vadd.f32 %v1027_v38, %v1026_v31 }
 0x133   :  { %1298 = vmatpush.bf16.msrb.mxu3 %v2831_v3  ;;  %1326 = vmatpush.bf16.msra.mxu1 %v2835_v5  ;;  %v3378_v3 = vld [vmem:[%s4290_s3 + $0xf4] sm:$0xf0]  ;;  %v3000_v5 = vld [vmem:[%s4290_s3 + $0xf8] sm:$0xf0] }
 0x134   :  { %v1029_v49 = vrot.slane %v1028_v43, 2  ;;  %v2999_v40 = vor.u32 %v3378_v3, %v2998_v42  ;;  %v3357_v42 = vld [vmem:[%s4290_s3 + $0x54] sm:$0xf]  ;;  %v2920_v3 = vld [vmem:[%s4290_s3 + $0x58] sm:$0xf0] }
 0x136   :  { %v1030_v51 = vadd.f32 %v1029_v49, %v1028_v43 }
 0x137   :  { %1299 = vmatpush.bf16.msrb.mxu3 %v2823_v10  ;;  %1327 = vmatpush.bf16.msra.mxu1 %v2827_v17  ;;  %v3376_v17 = vld [vmem:[%s4290_s3 + $0xe4] sm:$0xf0] }
 0x138   :  { %v1031_v61 = vrot.slane %v1030_v51, 1  ;;  %v2991_v28 = vor.u32 %v3376_v17, %v2990_v16 }
 0x13a   :  { %v1032_v0 = vadd.f32 %v1031_v61, %v1030_v51 }
 0x13b   :  { %1300 = vmatpush.bf16.msrb.mxu3 %v2815_v13  ;;  %1328 = vmatpush.bf16.msra.mxu1 %v2819_v15 }
 0x13c   :  { %v1034_v4 = vmul.f32 %v1032_v0, %v3697_v8 }
 0x13e   :  { %v1036_v6 = vadd.f32 1e-05, %v1034_v4  ;;  %v3377_v4 = vld [vmem:[%s4290_s3 + $0xf4] sm:$0xf] }
 0x13f   :  { %v3003_v9 = vor.u32 %v3377_v4, %v3000_v5  ;;  %1633 = vmatpush.bf16.msra.mxu3 %v2999_v40  ;;  %v2923_v5 = vor.u32 %v3357_v42, %v2920_v3  ;;  %v2944_v42 = vld [vmem:[%s4290_s3 + $0x88] sm:$0xf0] }
 0x140   :  { %3444 = vrsqrt.f32 %v1036_v6  ;;  %vm1053_vm5 = vweird.f32 %v1036_v6 }
 0x141   :  { %1661 = vmatpush.bf16.msrb.mxu1 %v3003_v9  ;;  %v3370_v9 = vld [vmem:[%s4290_s3 + $0xb4] sm:$0xf0] }
 0x143   :  { %1634 = vmatpush.bf16.msra.mxu3 %v2991_v28 }
 0x146   :  { %v3445_v20 = vpop.eup %3444 }
 0x147   :  { %v1048_v21 = vmul.f32 %v3445_v20, %v1036_v6  ;;  %vm1054_vm4 = vweird.f32 %v3445_v20 }
 0x148   :  { %vm1055_vm6 = vmor %vm1053_vm5, %vm1054_vm4 }
 0x149   :  { %v1049_v22 = vmul.f32 %v3445_v20, %v1048_v21  ;;  %v2995_v21 = vor.u32 %v3375_v18, %v2992_v54  ;;  %v2910_v18 = vld [vmem:[%s4290_s3 + $0x40] sm:$0xf]  ;;  %v3356_v54 = vld [vmem:[%s4290_s3 + $0x44] sm:$0xf0] }
 0x14b   :  { %v1050_v23 = vmul.f32 0.5, %v1049_v22  ;;  %v2934_v22 = vld [vmem:[%s4290_s3 + $0x70] sm:$0xf]  ;;  %1662 = vmatpush.bf16.msrb.mxu1 %v2995_v21 }
 0x14d   :  { %v1051_v24 = vsub.f32 1.5, %v1050_v23  ;;  %v3362_v23 = vld [vmem:[%s4290_s3 + $0x74] sm:$0xf0] }
 0x14f   :  { %v1052_v26 = vmul.f32 %v3445_v20, %v1051_v24  ;;  %v3361_v24 = vld [vmem:[%s4290_s3 + $0x74] sm:$0xf] }
 0x151   :  { %v1056_v27 = vsel %vm1055_vm6, %v3445_v20, %v1052_v26  ;;  %v2935_v26 = vor.u32 %v3362_v23, %v2934_v22 }
 0x152   :  { %v1058_v14 = vmul.f32 %v1056_v27, %v3920_v25  ;;  %v2936_v27 = vld [vmem:[%s4290_s3 + $0x78] sm:$0xf0] }
 0x153   :  { %1619 = vmatpush.bf16.msra.mxu2 %v2935_v26  ;;  %v3368_v26 = vld [vmem:[%s4290_s3 + $0xa4] sm:$0xf0] }
 0x154   :  { %v1060_v62 = vmul.f32 %v1058_v14, %v3829_v19  ;;  %v1070_v30 = vperm.slane %v1058_v14, 0 }
 0x156   :  { %v1064_v29 = vrot.slane %v1060_v62, 7  ;;  %v1072_v32 = vmul.f32 %v1070_v30, %v3803_v57  ;;  %v1074_v35 = vmul.f32 %v1070_v30, %v3805_v58  ;;  %v2982_v30 = vld [vmem:[%s4290_s3 + $0xd0] sm:$0xf] }
 0x158   :  { %v1068_v31 = vsub.f32 %v3920_v25, %v1064_v29  ;;  %v2939_v29 = vor.u32 %v3361_v24, %v2936_v27  ;;  %v2958_v24 = vld [vmem:[%s4290_s3 + $0xa0] sm:$0xf] }
 0x159   :  { %v2959_v27 = vor.u32 %v3368_v26, %v2958_v24 }
 0x15a   :  { %v1076_v33 = vperm.slane %v1068_v31, 1  ;;  %v3374_v31 = vld [vmem:[%s4290_s3 + $0xd4] sm:$0xf0]  ;;  %1647 = vmatpush.bf16.msrb.mxu0 %v2939_v29  ;;  %v2960_v29 = vld [vmem:[%s4290_s3 + $0xa8] sm:$0xf0] }
 0x15c   :  { %v1078_v34 = vadd.f32 %v1076_v33, %v1072_v32  ;;  %v1080_v36 = vadd.f32 %v1076_v33, %v1074_v35  ;;  %v3373_v32 = vld [vmem:[%s4290_s3 + $0xd4] sm:$0xf]  ;;  %v2983_v35 = vor.u32 %v3374_v31, %v2982_v30  ;;  %v2984_v33 = vld [vmem:[%s4290_s3 + $0xd8] sm:$0xf0] }
 0x15e   :  { %3446 = vtanh.f32 %v1078_v34  ;;  %1635 = vmatpush.bf16.msra.mxu3 %v2983_v35  ;;  %v2902_v35 = vld [vmem:[%s4290_s3 + $0x30] sm:$0xf] }
 0x15f   :  { %3448 = vtanh.f32 %v1080_v36 }
 0x164   :  { %v3447_v37 = vpop.eup %3446 }
 0x165   :  { %v3449_v38 = vpop.eup %3448 }
 0x166   :  { %v1086_v39 = vpack.c.bf16 %v3449_v38, %v3447_v37  ;;  %v2987_v38 = vor.u32 %v3373_v32, %v2984_v33  ;;  %v3354_v33 = vld [vmem:[%s4290_s3 + $0x34] sm:$0xf0] }
 0x168   :  { %1301 = vmatmul.bf16.vlgmr.msrb.gmra.mxu3 %v1086_v39  ;;  %1329 = vmatmul.bf16.vlgmr.msra.gmra.mxu1 %v1086_v39  ;;  %v2926_v39 = vld [vmem:[%s4290_s3 + $0x60] sm:$0xf] }
 0x169   :  { %1663 = vmatpush.bf16.msrb.mxu1 %v2987_v38 }
 0x1ab   :  { %v1316_v41 = vpop.f32.mrf.mxu0 }
 0x1b1   :  { %v1288_v43 = vpop.f32.mrf.mxu2 }
 0x1b3   :  { %v1318_v45 = vpop.f32.mrf.mxu0 }
 0x1b9   :  { %v1290_v49 = vpop.f32.mrf.mxu2 }
 0x1e5   :  { %v1330_v19 = vpop.f32.mrf.mxu1 }
 0x1e6   :  { %v3927_v47 = vadd.f32 %v1330_v19, %v1316_v41  ;;  %v3360_v41 = vld [vmem:[%s4290_s3 + $0x64] sm:$0xf0] }
 0x1e7   :  { %v2927_v19 = vor.u32 %v3360_v41, %v2926_v39 }
 0x1e9   :  { %1620 = vmatpush.bf16.msra.mxu2 %v2927_v19  ;;  %v2950_v19 = vld [vmem:[%s4290_s3 + $0x90] sm:$0xf] }
 0x1eb   :  { %v1302_v44 = vpop.f32.mrf.mxu3 }
 0x1ec   :  { %v3933_v51 = vadd.f32 %v1302_v44, %v1288_v43  ;;  %v3359_v43 = vld [vmem:[%s4290_s3 + $0x64] sm:$0xf]  ;;  %v2928_v44 = vld [vmem:[%s4290_s3 + $0x68] sm:$0xf0] }
 0x1ed   :  { %v1332_v46 = vpop.f32.mrf.mxu1 }
 0x1ee   :  { %v3929_v57 = vadd.f32 %v1332_v46, %v1318_v45 }
 0x1f0   :  { %v1342_v58 = vadd.f32 %v3929_v57, %v3927_v47 }
 0x1f2   :  { %v1343_v48 = vrot.slane %v1342_v58, 4 }
 0x1f3   :  { %v1304_v50 = vpop.f32.mrf.mxu3 }
 0x1f4   :  { %v1344_v52 = vadd.f32 %v1343_v48, %v1342_v58  ;;  %v3935_v53 = vadd.f32 %v1304_v50, %v1290_v49  ;;  %v2931_v48 = vor.u32 %v3359_v43, %v2928_v44  ;;  %v2974_v49 = vld [vmem:[%s4290_s3 + $0xc0] sm:$0xf]  ;;  %v3372_v50 = vld [vmem:[%s4290_s3 + $0xc4] sm:$0xf0]  ;;  %v3366_v43 = vld [vmem:[%s4290_s3 + $0x94] sm:$0xf0] }
 0x1f5   :  { %v3365_v44 = vld [vmem:[%s4290_s3 + $0x94] sm:$0xf] }
 0x1f6   :  { %v1345_v55 = vrot.slane %v1344_v52, 2  ;;  %v1335_v56 = vadd.f32 %v3935_v53, %v3933_v51  ;;  %1648 = vmatpush.bf16.msrb.mxu0 %v2931_v48  ;;  %v2894_v48 = vld [vmem:[%s4290_s3 + $0x20] sm:$0xf] }
 0x1f8   :  { %v1346_v60 = vadd.f32 %v1345_v55, %v1344_v52  ;;  %v1336_v61 = vrot.slane %v1335_v56, 4  ;;  %v3371_v52 = vld [vmem:[%s4290_s3 + $0xc4] sm:$0xf]  ;;  %v2975_v55 = vor.u32 %v3372_v50, %v2974_v49  ;;  %v3352_v49 = vld [vmem:[%s4290_s3 + $0x24] sm:$0xf0] }
 0x1f9   :  { %v3351_v50 = vld [vmem:[%s4290_s3 + $0x24] sm:$0xf] }
 0x1fa   :  { %v1347_v63 = vrot.slane %v1346_v60, 1  ;;  %v1337_v0 = vadd.f32 %v1336_v61, %v1335_v56  ;;  %v2976_v56 = vld [vmem:[%s4290_s3 + $0xc8] sm:$0xf0]  ;;  %1636 = vmatpush.bf16.msra.mxu3 %v2975_v55  ;;  %1649 = vmatpush.bf16.msrb.mxu0 %v2923_v5  ;;  %v2895_v55 = vor.u32 %v3352_v49, %v2894_v48  ;;  %v3350_v5 = vld [vmem:[%s4290_s3 + $0x14] sm:$0xf0] }
 0x1fc   :  { %v1348_v1 = vadd.f32 %v1347_v63, %v1346_v60  ;;  %v1338_v2 = vrot.slane %v1337_v0, 2  ;;  %v2979_v63 = vor.u32 %v3371_v52, %v2976_v56  ;;  %v2896_v56 = vld [vmem:[%s4290_s3 + $0x28] sm:$0xf0] }
 0x1fe   :  { %v3952_v6 = vmul.f32 %v1348_v1, %v3697_v8  ;;  %v1339_v7 = vadd.f32 %v1338_v2, %v1337_v0  ;;  %v2918_v0 = vld [vmem:[%s4290_s3 + $0x50] sm:$0xf]  ;;  %v3358_v1 = vld [vmem:[%s4290_s3 + $0x54] sm:$0xf0]  ;;  %1664 = vmatpush.bf16.msrb.mxu1 %v2979_v63  ;;  %v2942_v63 = vld [vmem:[%s4290_s3 + $0x80] sm:$0xf] }
 0x1ff   :  { %v2919_v2 = vor.u32 %v3358_v1, %v2918_v0  ;;  %v3364_v0 = vld [vmem:[%s4290_s3 + $0x84] sm:$0xf0]  ;;  %v3363_v1 = vld [vmem:[%s4290_s3 + $0x84] sm:$0xf] }
 0x200   :  { %v1352_v10 = vsub.f32 %v3927_v47, %v3952_v6  ;;  %v1354_v11 = vsub.f32 %v3929_v57, %v3952_v6  ;;  %v1340_v12 = vrot.slane %v1339_v7, 1 }
 0x201   :  { %1621 = vmatpush.bf16.msra.mxu2 %v2919_v2  ;;  %v2943_v2 = vor.u32 %v3364_v0, %v2942_v63 }
 0x202   :  { %v1356_v13 = vmul.f32 %v1352_v10, %v1352_v10  ;;  %v1358_v15 = vmul.f32 %v1354_v11, %v1354_v11  ;;  %v1341_v20 = vadd.f32 %v1340_v12, %v1339_v7  ;;  %v2966_v7 = vld [vmem:[%s4290_s3 + $0xb0] sm:$0xf]  ;;  %v3369_v11 = vld [vmem:[%s4290_s3 + $0xb4] sm:$0xf]  ;;  %v2968_v12 = vld [vmem:[%s4290_s3 + $0xb8] sm:$0xf0] }
 0x203   :  { %v2967_v10 = vor.u32 %v3370_v9, %v2966_v7  ;;  %v2971_v28 = vor.u32 %v3369_v11, %v2968_v12  ;;  %v3349_v9 = vld [vmem:[%s4290_s3 + $0x14] sm:$0xf] }
 0x204   :  { %v1366_v14 = vadd.f32 %v1358_v15, %v1356_v13  ;;  %v3983_v62 = vmul.f32 %v1341_v20, %v3697_v8  ;;  %v2911_v13 = vor.u32 %v3356_v54, %v2910_v18  ;;  %v3355_v15 = vld [vmem:[%s4290_s3 + $0x44] sm:$0xf]  ;;  %v2912_v20 = vld [vmem:[%s4290_s3 + $0x48] sm:$0xf0] }
 0x205   :  { %1637 = vmatpush.bf16.msra.mxu3 %v2967_v10  ;;  %1665 = vmatpush.bf16.msrb.mxu1 %v2971_v28  ;;  %v2915_v23 = vor.u32 %v3355_v15, %v2912_v20  ;;  %v2888_v10 = vld [vmem:[%s4290_s3 + $0x18] sm:$0xf0]  ;;  %v3348_v28 = vld [vmem:[%s4290_s3 + $0x4] sm:$0xf0]  ;;  %v2880_v15 = vld [vmem:[%s4290_s3 + $0x8] sm:$0xf0] }
 0x206   :  { %v1367_v34 = vrot.slane %v1366_v14, 4  ;;  %v1351_v36 = vsub.f32 %v3933_v51, %v3983_v62  ;;  %v1353_v37 = vsub.f32 %v3935_v53, %v3983_v62  ;;  %1622 = vmatpush.bf16.msra.mxu2 %v2911_v13  ;;  %v2891_v12 = vor.u32 %v3349_v9, %v2888_v10  ;;  %v3347_v13 = vld [vmem:[%s4290_s3 + $0x4] sm:$0xf] }
 0x207   :  { %1650 = vmatpush.bf16.msrb.mxu0 %v2915_v23  ;;  %v2883_v20 = vor.u32 %v3347_v13, %v2880_v15  ;;  %v3126_v15 = vld [vmem:[#allocation4 + $0xf0] sm:$0xf] }
 0x208   :  { %v1368_v45 = vadd.f32 %v1367_v34, %v1366_v14  ;;  %v1355_v46 = vmul.f32 %v1351_v36, %v1351_v36  ;;  %v1357_v58 = vmul.f32 %v1353_v37, %v1353_v37  ;;  %v3367_v14 = vld [vmem:[%s4290_s3 + $0xa4] sm:$0xf]  ;;  %v3353_v34 = vld [vmem:[%s4290_s3 + $0x34] sm:$0xf]  ;;  %v2903_v36 = vor.u32 %v3354_v33, %v2902_v35  ;;  %v2904_v37 = vld [vmem:[%s4290_s3 + $0x38] sm:$0xf0] }
 0x209   :  { %v2963_v32 = vor.u32 %v3367_v14, %v2960_v29  ;;  %1638 = vmatpush.bf16.msra.mxu3 %v2959_v27  ;;  %v2907_v41 = vor.u32 %v3353_v34, %v2904_v37 }
 0x20a   :  { %v1369_v60 = vrot.slane %v1368_v45, 2  ;;  %v1359_v61 = vadd.f32 %v1357_v58, %v1355_v46  ;;  %1623 = vmatpush.bf16.msra.mxu2 %v2903_v36  ;;  %v2951_v58 = vor.u32 %v3366_v43, %v2950_v19 }
 0x20b   :  { %1666 = vmatpush.bf16.msrb.mxu1 %v2963_v32  ;;  %1651 = vmatpush.bf16.msrb.mxu0 %v2907_v41 }
 0x20c   :  { %v1370_v40 = vadd.f32 %v1369_v60, %v1368_v45  ;;  %v1360_v4 = vrot.slane %v1359_v61, 4  ;;  %v2952_v45 = vld [vmem:[%s4290_s3 + $0x98] sm:$0xf0] }
 0x20d   :  { %v2955_v52 = vor.u32 %v3365_v44, %v2952_v45  ;;  %1639 = vmatpush.bf16.msra.mxu3 %v2951_v58 }
 0x20e   :  { %v1371_v16 = vrot.slane %v1370_v40, 1  ;;  %v1361_v17 = vadd.f32 %v1360_v4, %v1359_v61  ;;  %v2899_v61 = vor.u32 %v3351_v50, %v2896_v56  ;;  %1624 = vmatpush.bf16.msra.mxu2 %v2895_v55  ;;  %v2886_v4 = vld [vmem:[%s4290_s3 + $0x10] sm:$0xf] }
 0x20f   :  { %1667 = vmatpush.bf16.msrb.mxu1 %v2955_v52  ;;  %v2887_v7 = vor.u32 %v3350_v5, %v2886_v4 }
 0x210   :  { %v1372_v21 = vadd.f32 %v1371_v16, %v1370_v40  ;;  %v1362_v22 = vrot.slane %v1361_v17, 2  ;;  %1652 = vmatpush.bf16.msrb.mxu0 %v2899_v61  ;;  %v2947_v40 = vor.u32 %v3363_v1, %v2944_v42 }
 0x211   :  { %1640 = vmatpush.bf16.msra.mxu3 %v2943_v2 }
 0x212   :  { %v1374_v30 = vmul.f32 %v1372_v21, %v3697_v8  ;;  %v1363_v31 = vadd.f32 %v1362_v22, %v1361_v17  ;;  %1625 = vmatpush.bf16.msra.mxu2 %v2887_v7  ;;  %v2878_v17 = vld [vmem:[%s4290_s3] sm:$0xf] }
 0x213   :  { %1668 = vmatpush.bf16.msrb.mxu1 %v2947_v40  ;;  %v2879_v54 = vor.u32 %v3348_v28, %v2878_v17 }
 0x214   :  { %v1376_v38 = vadd.f32 1e-05, %v1374_v30  ;;  %v1364_v39 = vrot.slane %v1363_v31, 1  ;;  %1653 = vmatpush.bf16.msrb.mxu0 %v2891_v12 }
 0x216   :  { %3450 = vrsqrt.f32 %v1376_v38  ;;  %v1365_v46 = vadd.f32 %v1364_v39, %v1363_v31  ;;  %1626 = vmatpush.bf16.msra.mxu2 %v2879_v54  ;;  %vm1393_vm8 = vweird.f32 %v1376_v38 }
 0x218   :  { %v1373_v60 = vmul.f32 %v1365_v46, %v3697_v8  ;;  %1654 = vmatpush.bf16.msrb.mxu0 %v2883_v20  ;;  %v3410_v20 = vld [vmem:[#allocation4 + $0xf4] sm:$0xf0] }
 0x21a   :  { %v1375_v3 = vadd.f32 1e-05, %v1373_v60 }
 0x21c   :  { %v3451_v11 = vpop.eup %3450  ;;  %3452 = vrsqrt.f32 %v1375_v3  ;;  %vm1383_vm11 = vweird.f32 %v1375_v3 }
 0x21d   :  { %v1388_v16 = vmul.f32 %v3451_v11, %v1376_v38  ;;  %vm1394_vm7 = vweird.f32 %v3451_v11 }
 0x21e   :  { %vm1395_vm9 = vmor %vm1393_vm8, %vm1394_vm7 }
 0x21f   :  { %v1389_v18 = vmul.f32 %v3451_v11, %v1388_v16 }
 0x221   :  { %v1390_v21 = vmul.f32 0.5, %v1389_v18 }
 0x222   :  { %v3453_v22 = vpop.eup %3452 }
 0x223   :  { %v1391_v23 = vsub.f32 1.5, %v1390_v21  ;;  %v1378_v24 = vmul.f32 %v3453_v22, %v1375_v3  ;;  %vm1384_vm10 = vweird.f32 %v3453_v22  ;;  %v3127_v21 = vor.u32 %v3410_v20, %v3126_v15  ;;  %v3048_v15 = vld [vmem:[#allocation4 + $0x58] sm:$0xf0] }
 0x224   :  { %vm1385_vm12 = vmor %vm1383_vm11, %vm1384_vm10 }
 0x225   :  { %v1392_v26 = vmul.f32 %v3451_v11, %v1391_v23  ;;  %v1379_v27 = vmul.f32 %v3453_v22, %v1378_v24  ;;  %v3128_v23 = vld [vmem:[#allocation4 + $0xf8] sm:$0xf0]  ;;  %1973 = vmatpush.bf16.msrb.mxu3 %v3127_v21 }
 0x227   :  { %v1396_v14 = vsel %vm1395_vm9, %v3451_v11, %v1392_v26  ;;  %v1380_v29 = vmul.f32 0.5, %v1379_v27 }
 0x228   :  { %v1398_v30 = vmul.f32 %v1396_v14, %v3920_v25 }
 0x229   :  { %v1381_v31 = vsub.f32 1.5, %v1380_v29 }
 0x22a   :  { %v1400_v32 = vmul.f32 %v1398_v30, %v3952_v6  ;;  %v1410_v34 = vperm.slane %v1398_v30, 2 }
 0x22b   :  { %v1382_v35 = vmul.f32 %v3453_v22, %v1381_v31  ;;  %v3118_v31 = vld [vmem:[#allocation4 + $0xe0] sm:$0xf] }
 0x22c   :  { %v1404_v33 = vrot.slane %v1400_v32, 7  ;;  %v1412_v39 = vmul.f32 %v1410_v34, %v3927_v47  ;;  %v1414_v41 = vmul.f32 %v1410_v34, %v3929_v57  ;;  %v3408_v32 = vld [vmem:[#allocation4 + $0xe4] sm:$0xf0]  ;;  %v3120_v34 = vld [vmem:[#allocation4 + $0xe8] sm:$0xf0] }
 0x22d   :  { %v1386_v36 = vsel %vm1385_vm12, %v3453_v22, %v1382_v35  ;;  %v3409_v22 = vld [vmem:[#allocation4 + $0xf4] sm:$0xf]  ;;  %v3119_v35 = vor.u32 %v3408_v32, %v3118_v31 }
 0x22e   :  { %v1408_v37 = vsub.f32 %v3920_v25, %v1404_v33  ;;  %v1397_v38 = vmul.f32 %v1386_v36, %v3807_v59  ;;  %v3131_v27 = vor.u32 %v3409_v22, %v3128_v23  ;;  %v3407_v33 = vld [vmem:[#allocation4 + $0xe4] sm:$0xf]  ;;  %v3094_v23 = vld [vmem:[#allocation4 + $0xb0] sm:$0xf] }
 0x22f   :  { %1974 = vmatpush.bf16.msrb.mxu3 %v3119_v35  ;;  %v3038_v35 = vld [vmem:[#allocation4 + $0x40] sm:$0xf] }
 0x230   :  { %v1416_v19 = vperm.slane %v1408_v37, 3  ;;  %v1399_v43 = vmul.f32 %v1397_v38, %v3983_v62  ;;  %v1409_v46 = vperm.slane %v1397_v38, 2  ;;  %2001 = vmatpush.bf16.msra.mxu1 %v3131_v27 }
 0x232   :  { %v1418_v44 = vadd.f32 %v1416_v19, %v1412_v39  ;;  %v1420_v45 = vadd.f32 %v1416_v19, %v1414_v41  ;;  %v1403_v6 = vrot.slane %v1399_v43, 7  ;;  %v1411_v48 = vmul.f32 %v1409_v46, %v3933_v51  ;;  %v3062_v41 = vld [vmem:[#allocation4 + $0x70] sm:$0xf]  ;;  %v3394_v19 = vld [vmem:[#allocation4 + $0x74] sm:$0xf0] }
 0x233   :  { %v1413_v49 = vmul.f32 %v1409_v46, %v3935_v53  ;;  %v3123_v39 = vor.u32 %v3407_v33, %v3120_v34  ;;  %v3393_v43 = vld [vmem:[#allocation4 + $0x74] sm:$0xf]  ;;  %v3388_v33 = vld [vmem:[#allocation4 + $0x44] sm:$0xf0] }
 0x234   :  { %3454 = vtanh.f32 %v1418_v44  ;;  %v1407_v58 = vsub.f32 %v3807_v59, %v1403_v6  ;;  %v3063_v44 = vor.u32 %v3394_v19, %v3062_v41  ;;  %v3039_v34 = vor.u32 %v3388_v33, %v3038_v35  ;;  %v3086_v19 = vld [vmem:[#allocation4 + $0xa0] sm:$0xf]  ;;  %v3379_v33 = vld [vmem:[#allocation4 + $0x4] sm:$0xf] }
 0x235   :  { %3456 = vtanh.f32 %v1420_v45  ;;  %v3064_v45 = vld [vmem:[#allocation4 + $0x78] sm:$0xf0]  ;;  %2002 = vmatpush.bf16.msra.mxu1 %v3123_v39 }
 0x236   :  { %v1415_v50 = vperm.slane %v1407_v58, 3  ;;  %v3067_v58 = vor.u32 %v3393_v43, %v3064_v45  ;;  %1959 = vmatpush.bf16.msrb.mxu2 %v3063_v44  ;;  %v3400_v43 = vld [vmem:[#allocation4 + $0xa4] sm:$0xf0]  ;;  %v3399_v45 = vld [vmem:[#allocation4 + $0xa4] sm:$0xf] }
 0x237   :  { %v3087_v44 = vor.u32 %v3400_v43, %v3086_v19 }
 0x238   :  { %v1417_v52 = vadd.f32 %v1415_v50, %v1411_v48  ;;  %v1419_v47 = vadd.f32 %v1415_v50, %v1413_v49  ;;  %v3110_v48 = vld [vmem:[#allocation4 + $0xd0] sm:$0xf]  ;;  %v3406_v49 = vld [vmem:[#allocation4 + $0xd4] sm:$0xf0]  ;;  %v3405_v50 = vld [vmem:[#allocation4 + $0xd4] sm:$0xf]  ;;  %1987 = vmatpush.bf16.msra.mxu0 %v3067_v58 }
 0x23a   :  { %v3455_v55 = vpop.eup %3454  ;;  %3458 = vtanh.f32 %v1417_v52  ;;  %v3111_v52 = vor.u32 %v3406_v49, %v3110_v48 }
 0x23b   :  { %v3457_v57 = vpop.eup %3456  ;;  %3460 = vtanh.f32 %v1419_v47  ;;  %v3112_v47 = vld [vmem:[#allocation4 + $0xd8] sm:$0xf0] }
 0x23c   :  { %v1426_v62 = vpack.c.bf16 %v3457_v57, %v3455_v55  ;;  %1975 = vmatpush.bf16.msrb.mxu3 %v3111_v52  ;;  %v3386_v52 = vld [vmem:[#allocation4 + $0x34] sm:$0xf0] }
 0x23e   :  { %1641 = vmatmul.bf16.vlgmr.msra.gmra.mxu3 %v1426_v62  ;;  %1669 = vmatmul.bf16.vlgmr.msrb.gmra.mxu1 %v1426_v62 }
 0x240   :  { %v3459_v56 = vpop.eup %3458 }
 0x241   :  { %v3461_v60 = vpop.eup %3460 }
 0x242   :  { %v1425_v61 = vpack.c.bf16 %v3461_v60, %v3459_v56  ;;  %v3115_v56 = vor.u32 %v3405_v50, %v3112_v47  ;;  %v3054_v60 = vld [vmem:[#allocation4 + $0x60] sm:$0xf]  ;;  %v3030_v50 = vld [vmem:[#allocation4 + $0x30] sm:$0xf]  ;;  %v3385_v47 = vld [vmem:[#allocation4 + $0x34] sm:$0xf] }
 0x244   :  { %1627 = vmatmul.bf16.vlgmr.msra.gmra.mxu2 %v1425_v61  ;;  %1655 = vmatmul.bf16.vlgmr.msrb.gmra.mxu0 %v1425_v61  ;;  %v3392_v61 = vld [vmem:[#allocation4 + $0x64] sm:$0xf0] }
 0x245   :  { %2003 = vmatpush.bf16.msra.mxu1 %v3115_v56 }
 0x2bb   :  { %v1670_v59 = vpop.f32.mrf.mxu1 }
 0x2c1   :  { %v1656_v63 = vpop.f32.mrf.mxu0  ;;  %v1642_v51 = vpop.f32.mrf.mxu3 }
 0x2c2   :  { %v4157_v2 = vadd.f32 %v1670_v59, %v1656_v63  ;;  %v3055_v59 = vor.u32 %v3392_v61, %v3054_v60  ;;  %v3391_v63 = vld [vmem:[#allocation4 + $0x64] sm:$0xf]  ;;  %v3078_v61 = vld [vmem:[#allocation4 + $0x90] sm:$0xf] }
 0x2c3   :  { %v1672_v53 = vpop.f32.mrf.mxu1 }
 0x2c4   :  { %1960 = vmatpush.bf16.msrb.mxu2 %v3055_v59  ;;  %v3398_v59 = vld [vmem:[#allocation4 + $0x94] sm:$0xf0] }
 0x2c7   :  { %v1628_v0 = vpop.f32.mrf.mxu2 }
 0x2c8   :  { %v4163_v7 = vadd.f32 %v1642_v51, %v1628_v0  ;;  %v3056_v51 = vld [vmem:[#allocation4 + $0x68] sm:$0xf0] }
 0x2c9   :  { %v1658_v1 = vpop.f32.mrf.mxu0  ;;  %v1644_v4 = vpop.f32.mrf.mxu3 }
 0x2ca   :  { %v4159_v42 = vadd.f32 %v1672_v53, %v1658_v1 }
 0x2cc   :  { %v1682_v3 = vadd.f32 %v4159_v42, %v4157_v2 }
 0x2ce   :  { %v1683_v40 = vrot.slane %v1682_v3, 4 }
 0x2cf   :  { %v1630_v5 = vpop.f32.mrf.mxu2 }
 0x2d0   :  { %v1684_v9 = vadd.f32 %v1683_v40, %v1682_v3  ;;  %v4165_v10 = vadd.f32 %v1644_v4, %v1630_v5  ;;  %v3059_v3 = vor.u32 %v3391_v63, %v3056_v51  ;;  %v3102_v40 = vld [vmem:[#allocation4 + $0xc0] sm:$0xf]  ;;  %v3404_v4 = vld [vmem:[#allocation4 + $0xc4] sm:$0xf0]  ;;  %v3403_v5 = vld [vmem:[#allocation4 + $0xc4] sm:$0xf] }
 0x2d1   :  { %v3397_v63 = vld [vmem:[#allocation4 + $0x94] sm:$0xf]  ;;  %v3080_v51 = vld [vmem:[#allocation4 + $0x98] sm:$0xf0] }
 0x2d2   :  { %v1685_v11 = vrot.slane %v1684_v9, 2  ;;  %v1675_v12 = vadd.f32 %v4165_v10, %v4163_v7  ;;  %1988 = vmatpush.bf16.msra.mxu0 %v3059_v3  ;;  %v3384_v3 = vld [vmem:[#allocation4 + $0x24] sm:$0xf0] }
 0x2d4   :  { %v1686_v16 = vadd.f32 %v1685_v11, %v1684_v9  ;;  %v1676_v17 = vrot.slane %v1675_v12, 4  ;;  %v3103_v9 = vor.u32 %v3404_v4, %v3102_v40  ;;  %v3104_v11 = vld [vmem:[#allocation4 + $0xc8] sm:$0xf0]  ;;  %v3383_v40 = vld [vmem:[#allocation4 + $0x24] sm:$0xf]  ;;  %v3083_v4 = vor.u32 %v3397_v63, %v3080_v51 }
 0x2d6   :  { %v1687_v28 = vrot.slane %v1686_v16, 1  ;;  %v1677_v18 = vadd.f32 %v1676_v17, %v1675_v12  ;;  %v3107_v17 = vor.u32 %v3403_v5, %v3104_v11  ;;  %1976 = vmatpush.bf16.msrb.mxu3 %v3103_v9  ;;  %v3024_v9 = vld [vmem:[#allocation4 + $0x28] sm:$0xf0] }
 0x2d8   :  { %v1688_v54 = vadd.f32 %v1687_v28, %v1686_v16  ;;  %v1678_v13 = vrot.slane %v1677_v18, 2  ;;  %v3046_v28 = vld [vmem:[#allocation4 + $0x50] sm:$0xf]  ;;  %2004 = vmatpush.bf16.msra.mxu1 %v3107_v17  ;;  %v3396_v17 = vld [vmem:[#allocation4 + $0x84] sm:$0xf0] }
 0x2da   :  { %v4170_v24 = vmul.f32 %v1688_v54, %v3697_v8  ;;  %v1679_v26 = vadd.f32 %v1678_v13, %v1677_v18  ;;  %v3390_v18 = vld [vmem:[#allocation4 + $0x54] sm:$0xf0]  ;;  %v3389_v13 = vld [vmem:[#allocation4 + $0x54] sm:$0xf] }
 0x2db   :  { %v3047_v54 = vor.u32 %v3390_v18, %v3046_v28  ;;  %v3051_v22 = vor.u32 %v3389_v13, %v3048_v15  ;;  %v3395_v28 = vld [vmem:[#allocation4 + $0x84] sm:$0xf] }
 0x2dc   :  { %v1692_v14 = vsub.f32 %v4157_v2, %v4170_v24  ;;  %v1694_v29 = vsub.f32 %v4159_v42, %v4170_v24  ;;  %v1680_v30 = vrot.slane %v1679_v26, 1 }
 0x2dd   :  { %1961 = vmatpush.bf16.msrb.mxu2 %v3047_v54  ;;  %1989 = vmatpush.bf16.msra.mxu0 %v3051_v22  ;;  %v3072_v54 = vld [vmem:[#allocation4 + $0x88] sm:$0xf0] }
 0x2de   :  { %v1696_v36 = vmul.f32 %v1692_v14, %v1692_v14  ;;  %v1698_v37 = vmul.f32 %v1694_v29, %v1694_v29  ;;  %v1681_v38 = vadd.f32 %v1680_v30, %v1679_v26  ;;  %v3402_v26 = vld [vmem:[#allocation4 + $0xb4] sm:$0xf0]  ;;  %v3401_v14 = vld [vmem:[#allocation4 + $0xb4] sm:$0xf]  ;;  %v3096_v29 = vld [vmem:[#allocation4 + $0xb8] sm:$0xf0]  ;;  %v3075_v15 = vor.u32 %v3395_v28, %v3072_v54 }
 0x2df   :  { %v3095_v27 = vor.u32 %v3402_v26, %v3094_v23  ;;  %v3099_v32 = vor.u32 %v3401_v14, %v3096_v29  ;;  %v3381_v23 = vld [vmem:[#allocation4 + $0x14] sm:$0xf]  ;;  %v3016_v26 = vld [vmem:[#allocation4 + $0x18] sm:$0xf0] }
 0x2e0   :  { %v1706_v6 = vadd.f32 %v1698_v37, %v1696_v36  ;;  %v4177_v46 = vmul.f32 %v1681_v38, %v3697_v8  ;;  %v3387_v36 = vld [vmem:[#allocation4 + $0x44] sm:$0xf]  ;;  %v3040_v37 = vld [vmem:[#allocation4 + $0x48] sm:$0xf0]  ;;  %v3019_v14 = vor.u32 %v3381_v23, %v3016_v26 }
 0x2e1   :  { %1977 = vmatpush.bf16.msrb.mxu3 %v3095_v27  ;;  %2005 = vmatpush.bf16.msra.mxu1 %v3099_v32  ;;  %v3043_v41 = vor.u32 %v3387_v36, %v3040_v37 }
 0x2e2   :  { %v1707_v55 = vrot.slane %v1706_v6, 4  ;;  %v1691_v57 = vsub.f32 %v4163_v7, %v4177_v46  ;;  %v1693_v62 = vsub.f32 %v4165_v10, %v4177_v46  ;;  %1962 = vmatpush.bf16.msrb.mxu2 %v3039_v34  ;;  %v3008_v34 = vld [vmem:[#allocation4 + $0x8] sm:$0xf0] }
 0x2e3   :  { %1990 = vmatpush.bf16.msra.mxu0 %v3043_v41  ;;  %v3011_v36 = vor.u32 %v3379_v33, %v3008_v34  ;;  %v3426_v34 = vld [vmem:[%s4292_s5 + $0x78] sm:$0xff] }
 0x2e4   :  { %v1708_v0 = vadd.f32 %v1707_v55, %v1706_v6  ;;  %v1695_v53 = vmul.f32 %v1691_v57, %v1691_v57  ;;  %v1697_v1 = vmul.f32 %v1693_v62, %v1693_v62  ;;  %v3088_v6 = vld [vmem:[#allocation4 + $0xa8] sm:$0xf0]  ;;  %v3031_v55 = vor.u32 %v3386_v52, %v3030_v50  ;;  %v3032_v57 = vld [vmem:[#allocation4 + $0x38] sm:$0xf0] }
 0x2e5   :  { %v3091_v49 = vor.u32 %v3399_v45, %v3088_v6  ;;  %1978 = vmatpush.bf16.msrb.mxu3 %v3087_v44  ;;  %v3035_v60 = vor.u32 %v3385_v47, %v3032_v57  ;;  %v4188_v57 = vld [vmem:[#allocation6] sm:$0xff] }
 0x2e6   :  { %v1709_v12 = vrot.slane %v1708_v0, 2  ;;  %v1699_v16 = vadd.f32 %v1697_v1, %v1695_v53  ;;  %1963 = vmatpush.bf16.msrb.mxu2 %v3031_v55  ;;  %v3079_v53 = vor.u32 %v3398_v59, %v3078_v61  ;;  %v3022_v1 = vld [vmem:[#allocation4 + $0x20] sm:$0xf] }
 0x2e7   :  { %2006 = vmatpush.bf16.msra.mxu1 %v3091_v49  ;;  %1991 = vmatpush.bf16.msra.mxu0 %v3035_v60  ;;  %v3023_v5 = vor.u32 %v3384_v3, %v3022_v1 }
 0x2e8   :  { %v1710_v20 = vadd.f32 %v1709_v12, %v1708_v0  ;;  %v1700_v21 = vrot.slane %v1699_v16, 4  ;;  %v3027_v12 = vor.u32 %v3383_v40, %v3024_v9 }
 0x2e9   :  { %1979 = vmatpush.bf16.msrb.mxu3 %v3079_v53 }
 0x2ea   :  { %v1711_v30 = vrot.slane %v1710_v20, 1  ;;  %v1701_v31 = vadd.f32 %v1700_v21, %v1699_v16  ;;  %v3070_v16 = vld [vmem:[#allocation4 + $0x80] sm:$0xf]  ;;  %1964 = vmatpush.bf16.msrb.mxu2 %v3023_v5  ;;  %v3382_v21 = vld [vmem:[#allocation4 + $0x14] sm:$0xf0] }
 0x2eb   :  { %2007 = vmatpush.bf16.msra.mxu1 %v3083_v4  ;;  %v3071_v18 = vor.u32 %v3396_v17, %v3070_v16  ;;  %1992 = vmatpush.bf16.msra.mxu0 %v3027_v12 }
 0x2ec   :  { %v1712_v38 = vadd.f32 %v1711_v30, %v1710_v20  ;;  %v1702_v39 = vrot.slane %v1701_v31, 2  ;;  %v3014_v20 = vld [vmem:[#allocation4 + $0x10] sm:$0xf]  ;;  %v3006_v30 = vld [vmem:[#allocation4] sm:$0xf] }
 0x2ed   :  { %v3015_v22 = vor.u32 %v3382_v21, %v3014_v20  ;;  %1980 = vmatpush.bf16.msrb.mxu3 %v3071_v18 }
 0x2ee   :  { %v1714_v58 = vmul.f32 %v1712_v38, %v3697_v8  ;;  %v1703_v48 = vadd.f32 %v1702_v39, %v1701_v31  ;;  %v3380_v31 = vld [vmem:[#allocation4 + $0x4] sm:$0xf0] }
 0x2ef   :  { %2008 = vmatpush.bf16.msra.mxu1 %v3075_v15  ;;  %1965 = vmatpush.bf16.msrb.mxu2 %v3015_v22  ;;  %v3007_v35 = vor.u32 %v3380_v31, %v3006_v30 }
 0x2f0   :  { %v1716_v62 = vadd.f32 1e-05, %v1714_v58  ;;  %v1704_v56 = vrot.slane %v1703_v48, 1  ;;  %1993 = vmatpush.bf16.msra.mxu0 %v3019_v14 }
 0x2f1   :  { %2250 = vmatpush.bf16.msra.mxu3 %v3426_v34 }
 0x2f2   :  { %3462 = vrsqrt.f32 %v1716_v62  ;;  %v1705_v0 = vadd.f32 %v1704_v56, %v1703_v48  ;;  %vm1733_vm14 = vweird.f32 %v1716_v62 }
 0x2f3   :  { %1966 = vmatpush.bf16.msrb.mxu2 %v3007_v35 }
 0x2f4   :  { %v1713_v11 = vmul.f32 %v1705_v0, %v3697_v8  ;;  %1994 = vmatpush.bf16.msra.mxu0 %v3011_v36 }
 0x2f6   :  { %v1715_v13 = vadd.f32 1e-05, %v1713_v11 }
 0x2f8   :  { %v3463_v27 = vpop.eup %3462  ;;  %3464 = vrsqrt.f32 %v1715_v13  ;;  %vm1723_vm1 = vweird.f32 %v1715_v13 }
 0x2f9   :  { %v1728_v29 = vmul.f32 %v3463_v27, %v1716_v62  ;;  %vm1734_vm13 = vweird.f32 %v3463_v27 }
 0x2fa   :  { %vm1735_vm15 = vmor %vm1733_vm14, %vm1734_vm13 }
 0x2fb   :  { %v1729_v32 = vmul.f32 %v3463_v27, %v1728_v29 }
 0x2fd   :  { %v1730_v37 = vmul.f32 0.5, %v1729_v32 }
 0x2fe   :  { %v3465_v38 = vpop.eup %3464 }
 0x2ff   :  { %v1731_v39 = vsub.f32 1.5, %v1730_v37  ;;  %v1718_v41 = vmul.f32 %v3465_v38, %v1715_v13  ;;  %vm1724_vm0 = vweird.f32 %v3465_v38 }
 0x300   :  { %vm1725_vm2 = vmor %vm1723_vm1, %vm1724_vm0 }
 0x301   :  { %v1732_v19 = vmul.f32 %v3463_v27, %v1731_v39  ;;  %v1719_v43 = vmul.f32 %v3465_v38, %v1718_v41 }
 0x303   :  { %v1736_v44 = vsel %vm1735_vm15, %v3463_v27, %v1732_v19  ;;  %v1720_v45 = vmul.f32 0.5, %v1719_v43  ;;  %v3425_v19 = vld [vmem:[%s4292_s5 + $0x70] sm:$0xff] }
 0x304   :  { %v1738_v6 = vmul.f32 %v1736_v44, %v3920_v25  ;;  %2251 = vmatpush.bf16.msra.mxu3 %v3425_v19 }
 0x305   :  { %v1721_v58 = vsub.f32 1.5, %v1720_v45 }
 0x306   :  { %v1740_v48 = vmul.f32 %v1738_v6, %v4170_v24  ;;  %v1750_v52 = vperm.slane %v1738_v6, 4  ;;  %v3418_v6 = vld [vmem:[%s4292_s5 + $0x38] sm:$0xff] }
 0x307   :  { %v1722_v49 = vmul.f32 %v3465_v38, %v1721_v58  ;;  %2236 = vmatpush.bf16.msra.mxu2 %v3418_v6 }
 0x308   :  { %v1744_v50 = vrot.slane %v1740_v48, 7  ;;  %v1752_v56 = vmul.f32 %v1750_v52, %v4157_v2  ;;  %v1754_v60 = vmul.f32 %v1750_v52, %v4159_v42 }
 0x309   :  { %v1726_v47 = vsel %vm1725_vm2, %v3465_v38, %v1722_v49  ;;  %v3424_v49 = vld [vmem:[%s4292_s5 + $0x68] sm:$0xff] }
 0x30a   :  { %v1748_v55 = vsub.f32 %v3920_v25, %v1744_v50  ;;  %v1737_v62 = vmul.f32 %v4188_v57, %v1726_v47  ;;  %2252 = vmatpush.bf16.msra.mxu3 %v3424_v49 }
 0x30c   :  { %v1756_v61 = vperm.slane %v1748_v55, 5  ;;  %v1739_v59 = vmul.f32 %v1737_v62, %v4177_v46  ;;  %v1749_v0 = vperm.slane %v1737_v62, 4  ;;  %v3417_v55 = vld [vmem:[%s4292_s5 + $0x30] sm:$0xff] }
 0x30d   :  { %2237 = vmatpush.bf16.msra.mxu2 %v3417_v55 }
 0x30e   :  { %v1758_v24 = vadd.f32 %v1756_v61, %v1752_v56  ;;  %v1760_v63 = vadd.f32 %v1756_v61, %v1754_v60  ;;  %v1743_v51 = vrot.slane %v1739_v59, 7  ;;  %v1751_v25 = vmul.f32 %v1749_v0, %v4163_v7  ;;  %v3423_v61 = vld [vmem:[%s4292_s5 + $0x60] sm:$0xff] }
 0x30f   :  { %v1753_v1 = vmul.f32 %v1749_v0, %v4165_v10  ;;  %2253 = vmatpush.bf16.msra.mxu3 %v3423_v61 }
 0x310   :  { %3466 = vtanh.f32 %v1758_v24  ;;  %v1747_v53 = vsub.f32 %v4188_v57, %v1743_v51 }
 0x311   :  { %3468 = vtanh.f32 %v1760_v63  ;;  %v3416_v63 = vld [vmem:[%s4292_s5 + $0x28] sm:$0xff] }
 0x312   :  { %v1755_v3 = vperm.slane %v1747_v53, 5  ;;  %2238 = vmatpush.bf16.msra.mxu2 %v3416_v63  ;;  %v3422_v53 = vld [vmem:[%s4292_s5 + $0x58] sm:$0xff] }
 0x313   :  { %2254 = vmatpush.bf16.msra.mxu3 %v3422_v53  ;;  %v3435_v53 = vld [vmem:[#allocation6 + $0x10] ss:$0 sm:$0xff] }
 0x314   :  { %v1757_v40 = vadd.f32 %v1755_v3, %v1751_v25  ;;  %v1759_v2 = vadd.f32 %v1755_v3, %v1753_v1  ;;  %v3415_v3 = vld [vmem:[%s4292_s5 + $0x20] sm:$0xff] }
 0x316   :  { %v3467_v4 = vpop.eup %3466  ;;  %3470 = vtanh.f32 %v1757_v40  ;;  %2239 = vmatpush.bf16.msra.mxu2 %v3415_v3 }
 0x317   :  { %v3469_v42 = vpop.eup %3468  ;;  %3472 = vtanh.f32 %v1759_v2 }
 0x318   :  { %v1766_v46 = vpack.c.bf16 %v3469_v42, %v3467_v4  ;;  %v3421_v4 = vld [vmem:[%s4292_s5 + $0x50] sm:$0xff] }
 0x319   :  { %2255 = vmatpush.bf16.msra.mxu3 %v3421_v4 }
 0x31a   :  { %1981 = vmatmul.bf16.vlgmr.msrb.gmra.mxu3 %v1766_v46  ;;  %2009 = vmatmul.bf16.vlgmr.msra.gmra.mxu1 %v1766_v46 }
 0x31c   :  { %v3471_v5 = vpop.eup %3470 }
 0x31d   :  { %v3473_v9 = vpop.eup %3472 }
 0x31e   :  { %v1765_v11 = vpack.c.bf16 %v3473_v9, %v3471_v5  ;;  %v3414_v5 = vld [vmem:[%s4292_s5 + $0x18] sm:$0xff] }
 0x31f   :  { %2240 = vmatpush.bf16.msra.mxu2 %v3414_v5 }
 0x320   :  { %1967 = vmatmul.bf16.vlgmr.msrb.gmra.mxu2 %v1765_v11  ;;  %1995 = vmatmul.bf16.vlgmr.msra.gmra.mxu0 %v1765_v11 }
 0x397   :  { %v2010_v12 = vpop.f32.mrf.mxu1 }
 0x39d   :  { %v1996_v16 = vpop.f32.mrf.mxu0  ;;  %v1982_v7 = vpop.f32.mrf.mxu3 }
 0x39e   :  { %v4197_v18 = vadd.f32 %v2010_v12, %v1996_v16  ;;  %v3420_v12 = vld [vmem:[%s4292_s5 + $0x48] sm:$0xff] }
 0x39f   :  { %v2012_v10 = vpop.f32.mrf.mxu1  ;;  %2256 = vmatpush.bf16.msra.mxu3 %v3420_v12 }
 0x3a3   :  { %v1968_v17 = vpop.f32.mrf.mxu2 }
 0x3a4   :  { %v4203_v22 = vadd.f32 %v1982_v7, %v1968_v17  ;;  %v3413_v7 = vld [vmem:[%s4292_s5 + $0x10] sm:$0xff] }
 0x3a5   :  { %v1998_v28 = vpop.f32.mrf.mxu0  ;;  %v1984_v20 = vpop.f32.mrf.mxu3  ;;  %2241 = vmatpush.bf16.msra.mxu2 %v3413_v7 }
 0x3a6   :  { %v4199_v54 = vadd.f32 %v2012_v10, %v1998_v28  ;;  %v3419_v10 = vld [vmem:[%s4292_s5 + $0x40] sm:$0xff] }
 0x3a7   :  { %2257 = vmatpush.bf16.msra.mxu3 %v3419_v10 }
 0x3a8   :  { %v2022_v13 = vadd.f32 %v4199_v54, %v4197_v18 }
 0x3aa   :  { %v2023_v15 = vrot.slane %v2022_v13, 4 }
 0x3ab   :  { %v1970_v21 = vpop.f32.mrf.mxu2 }
 0x3ac   :  { %v2024_v23 = vadd.f32 %v2023_v15, %v2022_v13  ;;  %v4205_v26 = vadd.f32 %v1984_v20, %v1970_v21  ;;  %v3412_v13 = vld [vmem:[%s4292_s5 + $0x8] sm:$0xff]  ;;  %v3411_v21 = vld [vmem:[%s4292_s5] sm:$0xff] }
 0x3ad   :  { %2242 = vmatpush.bf16.msra.mxu2 %v3412_v13 }
 0x3ae   :  { %v2025_v27 = vrot.slane %v2024_v23, 2  ;;  %v2015_v14 = vadd.f32 %v4205_v26, %v4203_v22 }
 0x3b0   :  { %v2026_v29 = vadd.f32 %v2025_v27, %v2024_v23  ;;  %v2016_v30 = vrot.slane %v2015_v14, 4 }
 0x3b1   :  { %2243 = vmatpush.bf16.msra.mxu2 %v3411_v21 }
 0x3b2   :  { %v2027_v31 = vrot.slane %v2026_v29, 1  ;;  %v2017_v32 = vadd.f32 %v2016_v30, %v2015_v14 }
 0x3b4   :  { %v2028_v35 = vadd.f32 %v2027_v31, %v2026_v29  ;;  %v2018_v33 = vrot.slane %v2017_v32, 2 }
 0x3b6   :  { %v4213_v36 = vmul.f32 %v2028_v35, %v3697_v8  ;;  %v2019_v37 = vadd.f32 %v2018_v33, %v2017_v32  ;;  %v3487_v33 = vld [vmem:[#allocation6 + $0x8] sm:$0xff] }
 0x3b8   :  { %v2032_v38 = vsub.f32 %v4197_v18, %v4213_v36  ;;  %v2034_v39 = vsub.f32 %v4199_v54, %v4213_v36  ;;  %v2020_v41 = vrot.slane %v2019_v37, 1 }
 0x3ba   :  { %v2036_v43 = vmul.f32 %v2032_v38, %v2032_v38  ;;  %v2038_v44 = vmul.f32 %v2034_v39, %v2034_v39  ;;  %v2021_v45 = vadd.f32 %v2020_v41, %v2019_v37 }
 0x3bc   :  { %v2046_v58 = vadd.f32 %v2038_v44, %v2036_v43  ;;  %v4226_v48 = vmul.f32 %v2021_v45, %v3697_v8 }
 0x3be   :  { %v2047_v50 = vrot.slane %v2046_v58, 4  ;;  %v2031_v52 = vsub.f32 %v4203_v22, %v4226_v48  ;;  %v2033_v47 = vsub.f32 %v4205_v26, %v4226_v48 }
 0x3c0   :  { %v2048_v62 = vadd.f32 %v2047_v50, %v2046_v58  ;;  %v2035_v56 = vmul.f32 %v2031_v52, %v2031_v52  ;;  %v2037_v60 = vmul.f32 %v2033_v47, %v2033_v47 }
 0x3c2   :  { %v2049_v59 = vrot.slane %v2048_v62, 2  ;;  %v2039_v24 = vadd.f32 %v2037_v60, %v2035_v56 }
 0x3c4   :  { %v2050_v51 = vadd.f32 %v2049_v59, %v2048_v62  ;;  %v2040_v0 = vrot.slane %v2039_v24, 4 }
 0x3c6   :  { %v2051_v25 = vrot.slane %v2050_v51, 1  ;;  %v2041_v1 = vadd.f32 %v2040_v0, %v2039_v24 }
 0x3c8   :  { %v2052_v40 = vadd.f32 %v2051_v25, %v2050_v51  ;;  %v2042_v2 = vrot.slane %v2041_v1, 2 }
 0x3ca   :  { %v2054_v42 = vmul.f32 %v2052_v40, %v3697_v8  ;;  %v2043_v46 = vadd.f32 %v2042_v2, %v2041_v1 }
 0x3cc   :  { %v2056_v9 = vadd.f32 1e-05, %v2054_v42  ;;  %v2044_v11 = vrot.slane %v2043_v46, 1 }
 0x3ce   :  { %3474 = vrsqrt.f32 %v2056_v9  ;;  %v2045_v16 = vadd.f32 %v2044_v11, %v2043_v46  ;;  %vm2073_vm4 = vweird.f32 %v2056_v9 }
 0x3d0   :  { %v2053_v17 = vmul.f32 %v2045_v16, %v3697_v8 }
 0x3d2   :  { %v2055_v28 = vadd.f32 1e-05, %v2053_v17 }
 0x3d4   :  { %v3475_v15 = vpop.eup %3474  ;;  %3476 = vrsqrt.f32 %v2055_v28  ;;  %vm2063_vm7 = vweird.f32 %v2055_v28 }
 0x3d5   :  { %v2068_v20 = vmul.f32 %v3475_v15, %v2056_v9  ;;  %vm2074_vm3 = vweird.f32 %v3475_v15 }
 0x3d6   :  { %vm2075_vm5 = vmor %vm2073_vm4, %vm2074_vm3 }
 0x3d7   :  { %v2069_v8 = vmul.f32 %v3475_v15, %v2068_v20 }
 0x3d9   :  { %v2070_v23 = vmul.f32 0.5, %v2069_v8 }
 0x3da   :  { %v3477_v27 = vpop.eup %3476 }
 0x3db   :  { %v2071_v14 = vsub.f32 1.5, %v2070_v23  ;;  %v2058_v29 = vmul.f32 %v3477_v27, %v2055_v28  ;;  %vm2064_vm6 = vweird.f32 %v3477_v27 }
 0x3dc   :  { %vm2065_vm8 = vmor %vm2063_vm7, %vm2064_vm6 }
 0x3dd   :  { %v2072_v30 = vmul.f32 %v3475_v15, %v2071_v14  ;;  %v2059_v31 = vmul.f32 %v3477_v27, %v2058_v29 }
 0x3df   :  { %v2076_v32 = vsel %vm2075_vm5, %v3475_v15, %v2072_v30  ;;  %v2060_v35 = vmul.f32 0.5, %v2059_v31 }
 0x3e0   :  { %v2078_v34 = vmul.f32 %v3487_v33, %v2076_v32 }
 0x3e1   :  { %v2061_v37 = vsub.f32 1.5, %v2060_v35 }
 0x3e2   :  { %v2080_v38 = vmul.f32 %v2078_v34, %v4213_v36  ;;  %v2090_v19 = vperm.slane %v2078_v34, 6 }
 0x3e3   :  { %v2062_v39 = vmul.f32 %v3477_v27, %v2061_v37 }
 0x3e4   :  { %v2084_v41 = vrot.slane %v2080_v38, 7  ;;  %v2092_v6 = vmul.f32 %v2090_v19, %v4197_v18  ;;  %v2094_v58 = vmul.f32 %v2090_v19, %v4199_v54 }
 0x3e5   :  { %v2066_v43 = vsel %vm2065_vm8, %v3477_v27, %v2062_v39 }
 0x3e6   :  { %v2088_v44 = vsub.f32 %v3487_v33, %v2084_v41  ;;  %v2077_v45 = vmul.f32 %v4188_v57, %v2066_v43 }
 0x3e8   :  { %v2096_v49 = vperm.slane %v2088_v44, 7  ;;  %v2079_v50 = vmul.f32 %v2077_v45, %v4226_v48  ;;  %v2089_v36 = vperm.slane %v2077_v45, 6 }
 0x3ea   :  { %v2098_v52 = vadd.f32 %v2096_v49, %v2092_v6  ;;  %v2100_v47 = vadd.f32 %v2096_v49, %v2094_v58  ;;  %v2083_v55 = vrot.slane %v2079_v50, 7  ;;  %v2091_v56 = vmul.f32 %v2089_v36, %v4203_v22 }
 0x3eb   :  { %v2093_v60 = vmul.f32 %v2089_v36, %v4205_v26 }
 0x3ec   :  { %3478 = vtanh.f32 %v2098_v52  ;;  %v2087_v62 = vsub.f32 %v4188_v57, %v2083_v55 }
 0x3ed   :  { %3480 = vtanh.f32 %v2100_v47 }
 0x3ee   :  { %v2095_v61 = vperm.slane %v2087_v62, 7 }
 0x3f0   :  { %v2097_v59 = vadd.f32 %v2095_v61, %v2091_v56  ;;  %v2099_v18 = vadd.f32 %v2095_v61, %v2093_v60 }
 0x3f2   :  { %v3479_v24 = vpop.eup %3478  ;;  %3482 = vtanh.f32 %v2097_v59 }
 0x3f3   :  { %v3481_v54 = vpop.eup %3480  ;;  %3484 = vtanh.f32 %v2099_v18 }
 0x3f4   :  { %v2106_v48 = vpack.c.bf16 %v3481_v54, %v3479_v24 }
 0x3f6   :  { %2258 = vmatmul.bf16.vlgmr.msra.gmra.mxu3 %v2106_v48 }
 0x3f8   :  { %v3483_v63 = vpop.eup %3482 }
 0x3f9   :  { %v3485_v51 = vpop.eup %3484 }
 0x3fa   :  { %v2105_v0 = vpack.c.bf16 %v3485_v51, %v3483_v63 }
 0x3fc   :  { %2244 = vmatmul.bf16.vlgmr.msra.gmra.mxu2 %v2105_v0 }
 0x479   :  { %v2259_v57 = vpop.f32.mrf.mxu3 }
 0x47f   :  { %v2245_v25 = vpop.f32.mrf.mxu2 }
 0x480   :  { %v2246_v1 = vadd.f32 %v3435_v53, %v2245_v25 }
 0x481   :  { %v2261_v40 = vpop.f32.mrf.mxu3 }
 0x482   :  { %v2260_v22 = vadd.f32 %v2259_v57, %v2246_v1 }
 0x484   :  { %2264 = vst [vmem:[%s4294_s7] sm:$0xff] %v2260_v22 }
 0x487   :  { %v2247_v26 = vpop.f32.mrf.mxu2 }
 0x488   :  { %v2248_v3 = vadd.f32 %v3435_v53, %v2247_v26 }
 0x48a   :  { %v2262_v2 = vadd.f32 %v2261_v40, %v2248_v3 }
 0x48c   :  { %2265 = vst [vmem:[%s4294_s7 + $0x8] sm:$0xff] %v2262_v2 }
 0x48d   :  { %2270 = vsyncpa [#allocation3], 1 }
 0x48e   :  { %2271 = vsyncpa [#allocation5], 1 }

</bundles_post_ra>
